<compile_context>
chip_gen: v5e
topology: v5e:2x2
jax: 0.10.0
libtpu: 0.0.40
codegen_flags: <defaults>
</compile_context>

<pallas_src>
import jax
import jax.numpy as jnp
from jax.experimental import pallas as pl
from jax.experimental.pallas import tpu as pltpu


_MASK_FILL = -1000000000.0          # matches torch masked_fill value
_DEF_BLOCK_Q = 256                  # v7x-safe defaults (64 MiB VMEM)
_DEF_BLOCK_K = 512
_VMEM_LIMIT_BYTES = 48 * 1024 * 1024


def _pick_block(dim, target, multiple):
    """Largest block <= target that divides `dim` and is a multiple of
    `multiple`; falls back to the full dim (always legal)."""
    if dim <= target:
        return dim
    b = (target // multiple) * multiple
    while b >= multiple:
        if dim % b == 0:
            return b
        b -= multiple
    return dim


def _mask_bh_index(bh, B, H, mb, mh):
    """Map flattened (b*H + h) grid index onto the mask's broadcast
    (batch*head) leading dim."""
    if mb == 1 and mh == 1:
        return 0
    if mb == B and mh == H:
        return bh
    if mb == 1 and mh == H:
        return bh % H
    return bh // H          # mb == B, mh == 1


# --------------------------------------------------------------------------
# Kernel 1: returns both `out` and the full attention matrix.
# Grid: (B*H, Lq // tq); full Lk resident per step (required because the
# normalized attention weights are materialized).
# --------------------------------------------------------------------------
def _make_attn_kernel(inv_temperature, has_mask):
    def kernel(*refs):
        if has_mask:
            q_ref, k_ref, v_ref, m_ref, out_ref, attn_ref = refs
        else:
            q_ref, k_ref, v_ref, out_ref, attn_ref = refs

        # q_ref: (tq, Dk), k_ref: (Lk, Dk), v_ref: (Lk, Dv)
        q = q_ref[...] * inv_temperature                   # stays in input dtype
        # (tq, Lk): contract last dims of both operands (no materialized k.T)
        s = jax.lax.dot_general(
            q, k_ref[...], (((1,), (1,)), ((), ())),
            preferred_element_type=jnp.float32)
        if has_mask:
            s = jnp.where(m_ref[...] == 0, _MASK_FILL, s)

        s_max = jnp.max(s, axis=-1, keepdims=True)
        p = jnp.exp(s - s_max)
        denom = jnp.sum(p, axis=-1, keepdims=True)         # (tq, 1)
        attn = p * pl.reciprocal(denom, approx=False)      # column recip + mul
        attn_ref[...] = attn.astype(attn_ref.dtype)

        out = jax.lax.dot_general(
            attn.astype(v_ref.dtype), v_ref[...], (((1,), (0,)), ((), ())),
            preferred_element_type=jnp.float32)
        out_ref[...] = out.astype(out_ref.dtype)

    return kernel


# --------------------------------------------------------------------------
# Kernel 2: flash-style online softmax, output only (no attn writeback).
# Grid: (B*H, Lq // tq, Lk // tk), kv axis last and "arbitrary".
# --------------------------------------------------------------------------
def _make_flash_kernel(inv_temperature, has_mask):
    def kernel(*refs):
        if has_mask:
            q_ref, k_ref, v_ref, m_ref, out_ref, m_scr, l_scr, acc_scr = refs
        else:
            q_ref, k_ref, v_ref, out_ref, m_scr, l_scr, acc_scr = refs

        kv_idx = pl.program_id(2)

        @pl.when(kv_idx == 0)
        def _():
            m_scr[...] = jnp.full_like(m_scr, -jnp.inf)
            l_scr[...] = jnp.zeros_like(l_scr)
            acc_scr[...] = jnp.zeros_like(acc_scr)

        q = q_ref[...] * inv_temperature                    # (tq, Dk)
        s = jax.lax.dot_general(
            q, k_ref[...], (((1,), (1,)), ((), ())),
            preferred_element_type=jnp.float32)             # (tq, tk)
        if has_mask:
            s = jnp.where(m_ref[...] == 0, _MASK_FILL, s)

        m_prev = m_scr[...]
        m_cur = jnp.maximum(m_prev, jnp.max(s, axis=-1, keepdims=True))
        alpha = jnp.exp(m_prev - m_cur)
        p = jnp.exp(s - m_cur)
        l_scr[...] = alpha * l_scr[...] + jnp.sum(p, axis=-1, keepdims=True)
        acc_scr[...] = alpha * acc_scr[...] + jax.lax.dot_general(
            p.astype(v_ref.dtype), v_ref[...], (((1,), (0,)), ((), ())),
            preferred_element_type=jnp.float32)
        m_scr[...] = m_cur

        @pl.when(kv_idx == pl.num_programs(2) - 1)
        def _():
            out_ref[...] = (acc_scr[...] *
                            pl.reciprocal(l_scr[...], approx=True)
                            ).astype(out_ref.dtype)

    return kernel


def scaled_dot_product_attention(q, k, v, mask=None, *, temperature,
                                 return_attn=True,
                                 block_q=_DEF_BLOCK_Q, block_k=_DEF_BLOCK_K):
    """Pallas TPU ScaledDotProductAttention.

    return_attn=True  -> (out, attn), matching the PyTorch forward.
    return_attn=False -> out only, via a flash/online-softmax kernel with no
                         O(Lq*Lk) HBM writeback.
    """
    B, H, Lq, Dk = q.shape
    Lk = k.shape[2]
    Dv = v.shape[3]
    BH = B * H
    inv_temp = 1.0 / float(temperature)

    q3 = q.reshape(BH, Lq, Dk)
    k3 = k.reshape(BH, Lk, Dk)
    v3 = v.reshape(BH, Lk, Dv)

    tq = _pick_block(Lq, block_q, 8)

    has_mask = mask is not None
    if has_mask:
        mask = jnp.asarray(mask)
        assert mask.ndim == 4, "mask must be 4-D and broadcastable to (B,H,Lq,Lk)"
        mb, mh, mlq, mlk = mask.shape
        assert mb in (1, B) and mh in (1, H) and mlq in (1, Lq) and mlk in (1, Lk)
        # keep the mask at its natural broadcast shape (no B*H expansion in HBM)
        mask3 = mask.reshape(mb * mh, mlq, mlk).astype(jnp.float32)

    compiler_params_2d = pltpu.CompilerParams(
        dimension_semantics=("parallel", "parallel"),
        vmem_limit_bytes=_VMEM_LIMIT_BYTES)
    compiler_params_3d = pltpu.CompilerParams(
        dimension_semantics=("parallel", "parallel", "arbitrary"),
        vmem_limit_bytes=_VMEM_LIMIT_BYTES)

    if return_attn:
        grid = (BH, Lq // tq)
        in_specs = [
            pl.BlockSpec((None, tq, Dk), lambda b, i: (b, i, 0)),
            pl.BlockSpec((None, Lk, Dk), lambda b, i: (b, 0, 0)),
            pl.BlockSpec((None, Lk, Dv), lambda b, i: (b, 0, 0)),
        ]
        operands = [q3, k3, v3]
        if has_mask:
            mq_blk = tq if mlq == Lq else 1
            mk_blk = Lk if mlk == Lk else 1

            def mask_index(b, i):
                return (_mask_bh_index(b, B, H, mb, mh),
                        i if mlq == Lq else 0,
                        0)

            in_specs.append(pl.BlockSpec((None, mq_blk, mk_blk), mask_index))
            operands.append(mask3)

        kernel = _make_attn_kernel(inv_temp, has_mask)
        out3, attn3 = pl.pallas_call(
            kernel,
            out_shape=(jax.ShapeDtypeStruct((BH, Lq, Dv), q.dtype),
                       jax.ShapeDtypeStruct((BH, Lq, Lk), q.dtype)),
            grid=grid,
            in_specs=in_specs,
            out_specs=(pl.BlockSpec((None, tq, Dv), lambda b, i: (b, i, 0)),
                       pl.BlockSpec((None, tq, Lk), lambda b, i: (b, i, 0))),
            compiler_params=compiler_params_2d,
        )(*operands)
        return out3.reshape(B, H, Lq, Dv), attn3.reshape(B, H, Lq, Lk)

    # ----- flash path (no attention-weights output) -----
    tk = _pick_block(Lk, block_k, 128)
    grid = (BH, Lq // tq, Lk // tk)
    in_specs = [
        pl.BlockSpec((None, tq, Dk), lambda b, i, j: (b, i, 0)),
        pl.BlockSpec((None, tk, Dk), lambda b, i, j: (b, j, 0)),
        pl.BlockSpec((None, tk, Dv), lambda b, i, j: (b, j, 0)),
    ]
    operands = [q3, k3, v3]
    if has_mask:
        mq_blk = tq if mlq == Lq else 1
        mk_blk = tk if mlk == Lk else 1

        def mask_index(b, i, j):
            return (_mask_bh_index(b, B, H, mb, mh),
                    i if mlq == Lq else 0,
                    j if mlk == Lk else 0)

        in_specs.append(pl.BlockSpec((None, mq_blk, mk_blk), mask_index))
        operands.append(mask3)

    kernel = _make_flash_kernel(inv_temp, has_mask)
    out3 = pl.pallas_call(
        kernel,
        out_shape=jax.ShapeDtypeStruct((BH, Lq, Dv), q.dtype),
        grid=grid,
        in_specs=in_specs,
        out_specs=pl.BlockSpec((None, tq, Dv), lambda b, i, j: (b, i, 0)),
        scratch_shapes=[pltpu.VMEM((tq, 1), jnp.float32),   # running max
                        pltpu.VMEM((tq, 1), jnp.float32),   # running denom
                        pltpu.VMEM((tq, Dv), jnp.float32)], # running acc
        compiler_params=compiler_params_3d,
    )(*operands)
    return out3.reshape(B, H, Lq, Dv)


def _reference(q, k, v, mask, temperature):
    s = jnp.einsum("bhqd,bhkd->bhqk", q / temperature, k)
    if mask is not None:
        s = jnp.where(mask == 0, _MASK_FILL, s)
    attn = jax.nn.softmax(s, axis=-1)
    out = jnp.einsum("bhqk,bhkd->bhqd", attn, v)
    return out, attn


if __name__ == "__main__":
    B, H, Lq, Lk, Dk, Dv = 2, 2, 256, 256, 32, 32
    temperature = float(Dk) ** 0.5

    key = jax.random.PRNGKey(0)
    kq, kk, kv = jax.random.split(key, 3)
    q = jax.random.normal(kq, (B, H, Lq, Dk), dtype=jnp.float32)
    k = jax.random.normal(kk, (B, H, Lk, Dk), dtype=jnp.float32)
    v = jax.random.normal(kv, (B, H, Lk, Dv), dtype=jnp.float32)
    # causal mask at its natural broadcast shape (NOT expanded over B, H)
    mask = jnp.tril(jnp.ones((Lq, Lk), jnp.float32))[None, None]

    # block sizes chosen so the grids are genuinely multi-tile at this size
    out, attn = scaled_dot_product_attention(
        q, k, v, mask, temperature=temperature, block_q=128, block_k=128)
    jax.block_until_ready(out)
    jax.block_until_ready(attn)
    ref_out, ref_attn = _reference(q, k, v, mask, temperature)
    assert jnp.allclose(out, ref_out, atol=1e-4, rtol=1e-4)
    assert jnp.allclose(attn, ref_attn, atol=1e-4, rtol=1e-4)

    # mask=None path (mask operand dropped entirely)
    out2, attn2 = scaled_dot_product_attention(
        q, k, v, None, temperature=temperature, block_q=128, block_k=128)
    jax.block_until_ready(out2)
    ref_out2, ref_attn2 = _reference(q, k, v, None, temperature)
    assert jnp.allclose(out2, ref_out2, atol=1e-4, rtol=1e-4)
    assert jnp.allclose(attn2, ref_attn2, atol=1e-4, rtol=1e-4)

    # flash path (no attention-weights output); approx reciprocal in the
    # finalize -> slightly looser tolerance
    out3 = scaled_dot_product_attention(
        q, k, v, mask, temperature=temperature, return_attn=False,
        block_q=128, block_k=128)
    jax.block_until_ready(out3)
    assert jnp.allclose(out3, ref_out, atol=2e-3, rtol=2e-3)

    out4 = scaled_dot_product_attention(
        q, k, v, None, temperature=temperature, return_attn=False,
        block_q=128, block_k=128)
    jax.block_until_ready(out4)
    assert jnp.allclose(out4, ref_out2, atol=2e-3, rtol=2e-3)

    # tiny shapes (block == full dim fallback path)
    Bs, Hs, Ls, Ds = 2, 2, 8, 32
    qs = jax.random.normal(kq, (Bs, Hs, Ls, Ds), dtype=jnp.float32)
    ks = jax.random.normal(kk, (Bs, Hs, Ls, Ds), dtype=jnp.float32)
    vs = jax.random.normal(kv, (Bs, Hs, Ls, Ds), dtype=jnp.float32)
    ms = jnp.tril(jnp.ones((Ls, Ls), jnp.float32))[None, None]
    outs, attns = scaled_dot_product_attention(
        qs, ks, vs, ms, temperature=float(Ds) ** 0.5)
    jax.block_until_ready(outs)
    ref_os, ref_as = _reference(qs, ks, vs, ms, float(Ds) ** 0.5)
    assert jnp.allclose(outs, ref_os, atol=1e-4, rtol=1e-4)
    assert jnp.allclose(attns, ref_as, atol=1e-4, rtol=1e-4)

    print("KERNEL_OK")
</pallas_src>

<mosaic_0001>
module attributes {stable_mosaic.version = 11 : i64} {
  func.func @kernel(%arg0: i32, %arg1: i32, %arg2: memref<1x128x32xf32, #tpu.memory_space<vmem>>, %arg3: memref<1x256x32xf32, #tpu.memory_space<vmem>>, %arg4: memref<1x256x32xf32, #tpu.memory_space<vmem>>, %arg5: memref<1x128x256xf32, #tpu.memory_space<vmem>>, %arg6: memref<1x128x32xf32, #tpu.memory_space<vmem>>, %arg7: memref<1x128x256xf32, #tpu.memory_space<vmem>>) attributes {dimension_semantics = [#tpu.dimension_semantics<parallel>, #tpu.dimension_semantics<parallel>], iteration_bounds = array<i64: 4, 2>, scalar_prefetch = 0 : i64, scratch_operands = 0 : i64, tpu.core_type = #tpu.core_type<tc>, window_params = [{transform_indices = @transform_0, window_bounds = array<i64: 1, 128, 32>}, {transform_indices = @transform_1, window_bounds = array<i64: 1, 256, 32>}, {transform_indices = @transform_2, window_bounds = array<i64: 1, 256, 32>}, {transform_indices = @transform_3, window_bounds = array<i64: 1, 128, 256>}, {transform_indices = @transform_4, window_bounds = array<i64: 1, 128, 32>}, {transform_indices = @transform_5, window_bounds = array<i64: 1, 128, 256>}]} {
    %c0 = arith.constant 0 : index
    %c0_0 = arith.constant 0 : index
    %c0_1 = arith.constant 0 : index
    %0 = vector.load %arg2[%c0, %c0_0, %c0_1] : memref<1x128x32xf32, #tpu.memory_space<vmem>>, vector<1x128x32xf32>
    %1 = vector.shape_cast %0 : vector<1x128x32xf32> to vector<128x32xf32>
    %cst = arith.constant 0.176776692 : f32
    %2 = vector.broadcast %cst : f32 to vector<128x32xf32>
    %3 = arith.mulf %1, %2 : vector<128x32xf32>
    %c0_2 = arith.constant 0 : index
    %c0_3 = arith.constant 0 : index
    %c0_4 = arith.constant 0 : index
    %4 = vector.load %arg3[%c0_2, %c0_3, %c0_4] : memref<1x256x32xf32, #tpu.memory_space<vmem>>, vector<1x256x32xf32>
    %5 = vector.shape_cast %4 : vector<1x256x32xf32> to vector<256x32xf32>
    %cst_5 = arith.constant dense<0.000000e+00> : vector<128x256xf32>
    %6 = tpu.matmul %3, %5, %cst_5 {dimension_numbers = #tpu.dot_dimension_numbers<[1], [1], [0], [0], [0, 0, 1, 0], [], []>} : vector<128x32xf32>, vector<256x32xf32>, vector<128x256xf32> -> vector<128x256xf32>
    %c0_6 = arith.constant 0 : index
    %c0_7 = arith.constant 0 : index
    %c0_8 = arith.constant 0 : index
    %7 = vector.load %arg5[%c0_6, %c0_7, %c0_8] : memref<1x128x256xf32, #tpu.memory_space<vmem>>, vector<1x128x256xf32>
    %8 = vector.shape_cast %7 : vector<1x128x256xf32> to vector<128x256xf32>
    %cst_9 = arith.constant 0.000000e+00 : f32
    %9 = vector.broadcast %cst_9 : f32 to vector<128x256xf32>
    %10 = arith.cmpf oeq, %8, %9 : vector<128x256xf32>
    %cst_10 = arith.constant -1.000000e+09 : f32
    %11 = vector.broadcast %cst_10 : f32 to vector<128x256xf32>
    %12 = arith.select %10, %11, %6 : vector<128x256xi1>, vector<128x256xf32>
    %cst_11 = arith.constant dense<0xFF800000> : vector<128xf32>
    %13 = vector.multi_reduction <maximumf>, %12, %cst_11 [1] : vector<128x256xf32> to vector<128xf32>
    %14 = vector.shape_cast %13 : vector<128xf32> to vector<128x1xf32>
    %15 = vector.broadcast %14 : vector<128x1xf32> to vector<128x256xf32>
    %16 = arith.subf %12, %15 : vector<128x256xf32>
    %17 = math.exp %16 : vector<128x256xf32>
    %cst_12 = arith.constant dense<0.000000e+00> : vector<128xf32>
    %18 = vector.multi_reduction <add>, %17, %cst_12 [1] : vector<128x256xf32> to vector<128xf32>
    %19 = vector.shape_cast %18 : vector<128xf32> to vector<128x1xf32>
    %20 = tpu.reciprocal %19 : vector<128x1xf32> -> vector<128x1xf32>
    %21 = vector.broadcast %20 : vector<128x1xf32> to vector<128x256xf32>
    %22 = arith.mulf %17, %21 : vector<128x256xf32>
    %c0_13 = arith.constant 0 : index
    %c0_14 = arith.constant 0 : index
    %c0_15 = arith.constant 0 : index
    %23 = vector.load %arg7[%c0_13, %c0_14, %c0_15] : memref<1x128x256xf32, #tpu.memory_space<vmem>>, vector<1x128x256xf32>
    %24 = vector.shape_cast %23 : vector<1x128x256xf32> to vector<128x256xf32>
    %25 = vector.shape_cast %22 : vector<128x256xf32> to vector<1x128x256xf32>
    tpu.vector_store %arg7[%c0_13, %c0_14, %c0_15], %25 {strides = array<i32>} : memref<1x128x256xf32, #tpu.memory_space<vmem>>, vector<1x128x256xf32>,
    %c0_16 = arith.constant 0 : index
    %c0_17 = arith.constant 0 : index
    %c0_18 = arith.constant 0 : index
    %26 = vector.load %arg4[%c0_16, %c0_17, %c0_18] : memref<1x256x32xf32, #tpu.memory_space<vmem>>, vector<1x256x32xf32>
    %27 = vector.shape_cast %26 : vector<1x256x32xf32> to vector<256x32xf32>
    %cst_19 = arith.constant dense<0.000000e+00> : vector<128x32xf32>
    %28 = tpu.matmul %22, %27, %cst_19 {dimension_numbers = #tpu.dot_dimension_numbers<[1], [0], [0], [1], [0, 0, 1, 1], [], []>} : vector<128x256xf32>, vector<256x32xf32>, vector<128x32xf32> -> vector<128x32xf32>
    %c0_20 = arith.constant 0 : index
    %c0_21 = arith.constant 0 : index
    %c0_22 = arith.constant 0 : index
    %29 = vector.load %arg6[%c0_20, %c0_21, %c0_22] : memref<1x128x32xf32, #tpu.memory_space<vmem>>, vector<1x128x32xf32>
    %30 = vector.shape_cast %29 : vector<1x128x32xf32> to vector<128x32xf32>
    %31 = vector.shape_cast %28 : vector<128x32xf32> to vector<1x128x32xf32>
    tpu.vector_store %arg6[%c0_20, %c0_21, %c0_22], %31 {strides = array<i32>} : memref<1x128x32xf32, #tpu.memory_space<vmem>>, vector<1x128x32xf32>,
    return
  }
  func.func @transform_0(%arg0: i32, %arg1: i32) -> (i32, i32, i32) {
    %c0_i32 = arith.constant 0 : i32
    %c0_i32_0 = arith.constant 0 : i32
    return %arg0, %arg1, %c0_i32 : i32, i32, i32
  }
  func.func @transform_1(%arg0: i32, %arg1: i32) -> (i32, i32, i32) {
    %c0_i32 = arith.constant 0 : i32
    %c0_i32_0 = arith.constant 0 : i32
    %c0_i32_1 = arith.constant 0 : i32
    return %arg0, %c0_i32, %c0_i32_0 : i32, i32, i32
  }
  func.func @transform_2(%arg0: i32, %arg1: i32) -> (i32, i32, i32) {
    %c0_i32 = arith.constant 0 : i32
    %c0_i32_0 = arith.constant 0 : i32
    %c0_i32_1 = arith.constant 0 : i32
    return %arg0, %c0_i32, %c0_i32_0 : i32, i32, i32
  }
  func.func @transform_3(%arg0: i32, %arg1: i32) -> (i32, i32, i32) {
    %c0_i32 = arith.constant 0 : i32
    %c0_i32_0 = arith.constant 0 : i32
    %c0_i32_1 = arith.constant 0 : i32
    return %c0_i32, %arg1, %c0_i32_0 : i32, i32, i32
  }
  func.func @transform_4(%arg0: i32, %arg1: i32) -> (i32, i32, i32) {
    %c0_i32 = arith.constant 0 : i32
    %c0_i32_0 = arith.constant 0 : i32
    return %arg0, %arg1, %c0_i32 : i32, i32, i32
  }
  func.func @transform_5(%arg0: i32, %arg1: i32) -> (i32, i32, i32) {
    %c0_i32 = arith.constant 0 : i32
    %c0_i32_0 = arith.constant 0 : i32
    return %arg0, %arg1, %c0_i32 : i32, i32, i32
  }
}

</mosaic_0001>

<bundles_post_ra>
// kernel: tpu_custom_call.1
= control target key start
LH: loop header
LB: loop body
LE: loop exit
PB: predicated region body
PF: predicated region fallthrough
CT: control target
= control target key end

     0   :  { %s2721_s0 = inlined_call_operand.vmem [shape: f32[4,256,32], index: 0, kind: input, shape index: {}]   ;;  %s2722_s1 = inlined_call_operand.vmem [shape: f32[4,256,32], index: 1, kind: input, shape index: {}]   ;;  %s2723_s2 = inlined_call_operand.vmem [shape: f32[4,256,32], index: 2, kind: input, shape index: {}]   ;;  %s2724_s3 = inlined_call_operand.vmem [shape: f32[1,256,256], index: 3, kind: input, shape index: {}]   ;;  %s2725_s4 = inlined_call_operand.vmem [shape: f32[4,256,32], index: 4, kind: output, shape index: {0}]   ;;  %s2726_s5 = inlined_call_operand.hbm [shape: f32[4,256,256], index: 5, kind: output, shape index: {1}]  }
   0x1   :  { %2727 = sst [smem:[#allocation5_spill]] %s2721_s0 }
   0x2   :  { %2728 = sst [smem:[#allocation6_spill]] %s2722_s1 }
   0x3   :  { %2729 = sst [smem:[#allocation7_spill]] %s2723_s2 }
   0x4   :  { %11 = vsyncpa [#allocation3], 0 }
   0x5   :  { %13 = vsyncpa [#allocation3 + $0x1], 0  ;;  %s2014_s18 = smov 0   ;;  %s2016_s19 = smov 0  }
   0x6   :  { %s2018_s20 = smov 0   ;;  %s2020_s21 = smov 0  }
   0x7   :  { %s2022_s22 = smov 0   ;;  %s2024_s23 = smov 0  }
   0x8   :  { %s2026_s24 = smov 0   ;;  %s2028_s25 = smov 0  }
   0x9 LB: > { %s1623_s26 = sadd.s32 4294967295, %s1980_s25   ;;  %s1624_s27 = sadd.s32 4294967294, %s1980_s25   ;;  %s1980_s25 = sphi %s2028_s25, %s19_s25   ;;  %s1976_s24 = sphi %s2026_s24, %s2741_s24   ;;  %s1972_s23 = sphi %s2024_s23, %s2740_s23   ;;  %s1968_s22 = sphi %s2022_s22, %s2739_s22   ;;  %s1964_s21 = sphi %s2020_s21, %s2738_s21   ;;  %s1960_s20 = sphi %s2018_s20, %s2737_s20   ;;  %s1956_s19 = sphi %s2016_s19, %s2736_s19   ;;  %s1952_s18 = sphi %s2014_s18, %s2735_s18  }
   0xa   : > { %s28_s28 = sadd.s32 1, %s1972_s23  ;;  %s31_s29 = sadd.s32 1, %s1976_s24 }
   0xb   : > { %p29_p0 = scmp.ge.s32.totalorder %s28_s28, 2  ;;  %p184_p1 = scmp.ne.s32.totalorder %s1960_s20, %s1956_s19 }
   0xc   : > { %p185_p2 = scmp.eq.s32.totalorder %s1623_s26, 7  ;;  %p190_p5 = scmp.ne.s32.totalorder %s1956_s19, %s1952_s18 }
   0xd   : > { %s2743_s28 = smov (%p29_p0, %s28_s28), 0  ;;  %s2745_s29 = smov (!%p29_p0, %s31_s29), %s1976_s24 }
   0xe   : > { %s170_s30 = ssub.s32 %s1972_s23, %s2743_s28  ;;  %p2065_p3 = por %p185_p2, %p184_p1 }
   0xf   : > { %p33_p4 = scmp.ge.s32.totalorder %s2745_s29, 4  ;;  %p191_p6 = scmp.eq.s32.totalorder %s1624_s27, 7 }
  0x10   : > { %p1627_p7 = scmp.ge.s32.totalorder %s1980_s25, 1  ;;  %p248_p9 = scmp.lt.s32.totalorder %s1980_s25, 9 }
  0x11   : > { %s2747_s29 = smov (%p33_p4, %s2745_s29), 0  ;;  %p2074_p8 = por %p191_p6, %p190_p5 }
  0x12   : > { %s169_s8 = ssub.s32 %s1976_s24, %s2747_s29  ;;  %s174_s9 = sadd.s32 1, %s1960_s20 }
  0x13   : > { %s171_s10 = sor.u32 %s170_s30, %s169_s8  ;;  %p249_p10 = pnand %p1627_p7, %p248_p9 }
  0x14   : > { %p172_p11 = scmp.eq.s32.totalorder %s171_s10, 0  ;;  %p306_p12 = scmp.lt.s32.totalorder (!%p249_p10), %s1968_s22, 3 }
  0x15   : > { %252 = sbr.rel (%p249_p10) target bundleno = 818 (0x332), region = 36  ;;  %s2732_s1 = sld [smem:[#allocation6_spill]] (!%p249_p10) }
  0x16   : > { %s2083_s11 = scalar_select %p172_p11, %s1960_s20, %s174_s9  }
  0x17   : > { %s1629_s17 = sshll.u32 (!%p249_p10), %s1964_s21, 4  ;;  %s2733_s0 = sld [smem:[#allocation5_spill]] (!%p249_p10) }
  0x18   : > { %p308_p13 = scmp.lt.s32.totalorder (!%p249_p10), %s1629_s17, 31  ;;  %s2734_s2 = sld [smem:[#allocation7_spill]] (!%p249_p10) }
  0x1a   : > { %s2087_s12 = scalar_select %p306_p12, %s1968_s22, 3  ;;  %vm407_vm0 = vcmask 261120  }
  0x1b   : > { %s2749_s17 = smov (!%p308_p13, %s1629_s17), 31 }
  0x1c   : > { %s1713_s13 = sshll.u32 %s2087_s12, 8  ;;  %s1630_s26 = sshll.u32 %s2087_s12, 5 }
  0x1d   : > { %s2095_s16 = scalar_lea.vmem %s2732_s1, %s1713_s13  ;;  %s2152_s27 = sadd.s32 %s1630_s26, %s2749_s17 }
  0x1e   : > { %v390_v0 = vld [vmem:[%s2095_s16 + $0x78] sm:$0xff]  ;;  %v389_v2 = vld [vmem:[%s2095_s16 + $0x70] sm:$0xff]  ;;  %v388_v4 = vld [vmem:[%s2095_s16 + $0x68] sm:$0xff]  ;;  %s1631_s30 = sshll.u32 %s2152_s27, 3  ;;  %s1715_s14 = sshll.u32 %s2749_s17, 4 }
  0x1f   : > { %v406_v1 = vld [vmem:[%s2095_s16 + $0xf8] sm:$0xff]  ;;  %1642 = vmatpush.xpose.msk.msra.mxu0 %vm407_vm0, %v390_v0  ;;  %v405_v3 = vld [vmem:[%s2095_s16 + $0xf0] sm:$0xff]  ;;  %v404_v5 = vld [vmem:[%s2095_s16 + $0xe8] sm:$0xff]  ;;  %s2168_s10 = scalar_lea.vmem %s2733_s0, %s1631_s30  ;;  %s2210_s26 = scalar_lea.vmem %s2724_s3, %s1715_s14 }
  0x20   : > { %1674 = vmatpush.xpose.msk.msra.mxu1 %vm407_vm0, %v406_v1  ;;  %v387_v6 = vld [vmem:[%s2095_s16 + $0x60] sm:$0xff]  ;;  %v386_v8 = vld [vmem:[%s2095_s16 + $0x58] sm:$0xff]  ;;  %v385_v10 = vld [vmem:[%s2095_s16 + $0x50] sm:$0xff]  ;;  %s2373_s9 = scalar_lea.vmem %s2734_s2, %s1713_s13  ;;  %s302_s12 = sand.u32 1, %s1956_s19  }
  0x21   : > { %v403_v7 = vld [vmem:[%s2095_s16 + $0xe0] sm:$0xff]  ;;  %v402_v9 = vld [vmem:[%s2095_s16 + $0xd8] sm:$0xff]  ;;  %v401_v11 = vld [vmem:[%s2095_s16 + $0xd0] sm:$0xff]  ;;  %s1628_s13 = sshll.u32 %s302_s12, 8  ;;  %s1716_s27 = sshll.u32 %s1964_s21, 5 }
  0x22   : > { %v384_v12 = vld [vmem:[%s2095_s16 + $0x48] sm:$0xff]  ;;  %v383_v14 = vld [vmem:[%s2095_s16 + $0x40] sm:$0xff]  ;;  %v382_v16 = vld [vmem:[%s2095_s16 + $0x38] sm:$0xff]  ;;  %s1446_s0 = scalar_lea.sflag [#allocation3], %s302_s12 }
  0x23   : > { %1643 = vmatpush.xpose.msk.msra.mxu0 %vm407_vm0, %v389_v2  ;;  %v400_v13 = vld [vmem:[%s2095_s16 + $0xc8] sm:$0xff]  ;;  %v399_v15 = vld [vmem:[%s2095_s16 + $0xc0] sm:$0xff]  ;;  %v398_v17 = vld [vmem:[%s2095_s16 + $0xb8] sm:$0xff] }
  0x24   : > { %1675 = vmatpush.xpose.msk.msra.mxu1 %vm407_vm0, %v405_v3  ;;  %v381_v18 = vld [vmem:[%s2095_s16 + $0x30] sm:$0xff]  ;;  %v380_v20 = vld [vmem:[%s2095_s16 + $0x28] sm:$0xff]  ;;  %v379_v22 = vld [vmem:[%s2095_s16 + $0x20] sm:$0xff] }
  0x25   : > { %v397_v19 = vld [vmem:[%s2095_s16 + $0xb0] sm:$0xff]  ;;  %v396_v21 = vld [vmem:[%s2095_s16 + $0xa8] sm:$0xff]  ;;  %v395_v23 = vld [vmem:[%s2095_s16 + $0xa0] sm:$0xff] }
  0x26   : > { %v378_v24 = vld [vmem:[%s2095_s16 + $0x18] sm:$0xff]  ;;  %v377_v26 = vld [vmem:[%s2095_s16 + $0x10] sm:$0xff]  ;;  %v376_v28 = vld [vmem:[%s2095_s16 + $0x8] sm:$0xff] }
  0x27   : > { %1644 = vmatpush.xpose.msk.msra.mxu0 %vm407_vm0, %v388_v4  ;;  %v394_v25 = vld [vmem:[%s2095_s16 + $0x98] sm:$0xff]  ;;  %v393_v27 = vld [vmem:[%s2095_s16 + $0x90] sm:$0xff]  ;;  %v392_v29 = vld [vmem:[%s2095_s16 + $0x88] sm:$0xff] }
  0x28   : > { %1676 = vmatpush.xpose.msk.msra.mxu1 %vm407_vm0, %v404_v5  ;;  %v343_v30 = vld [vmem:[%s2168_s10] sm:$0xff]  ;;  %v344_v34 = vld [vmem:[%s2168_s10 + $0x8] sm:$0xff]  ;;  %v345_v36 = vld [vmem:[%s2168_s10 + $0x10] sm:$0xff] }
  0x29   : > { %v375_v31 = vld [vmem:[%s2095_s16] sm:$0xff]  ;;  %v359_v33 = vmul.f32 0.17677669, %v343_v30  ;;  %v360_v35 = vmul.f32 0.17677669, %v344_v34  ;;  %v346_v38 = vld [vmem:[%s2168_s10 + $0x18] sm:$0xff] }
  0x2a   : > { %v391_v32 = vld [vmem:[%s2095_s16 + $0x80] sm:$0xff]  ;;  %v361_v37 = vmul.f32 0.17677669, %v345_v36  ;;  %v362_v39 = vmul.f32 0.17677669, %v346_v38  ;;  %v348_v42 = vld [vmem:[%s2168_s10 + $0x28] sm:$0xff]  ;;  %s2609_s16 = scalar_lea.vmem %s2725_s4, %s1631_s30 }
  0x2b   : > { %1645 = vmatpush.xpose.msk.msra.mxu0 %vm407_vm0, %v387_v6  ;;  %v347_v40 = vld [vmem:[%s2168_s10 + $0x20] sm:$0xff]  ;;  %v364_v43 = vmul.f32 0.17677669, %v348_v42  ;;  %v349_v44 = vld [vmem:[%s2168_s10 + $0x30] sm:$0xff]  ;;  %v350_v46 = vld [vmem:[%s2168_s10 + $0x38] sm:$0xff]  ;;  %s1709_s30 = sshll.u32 %s1968_s22, 6 }
  0x2c   : > { %1677 = vmatpush.xpose.msk.msra.mxu1 %vm407_vm0, %v403_v7  ;;  %v363_v41 = vmul.f32 0.17677669, %v347_v40  ;;  %v365_v45 = vmul.f32 0.17677669, %v349_v44  ;;  %v366_v47 = vmul.f32 0.17677669, %v350_v46 }
  0x2d   : > { %v351_v48 = vld [vmem:[%s2168_s10 + $0x40] sm:$0xff]  ;;  %v352_v50 = vld [vmem:[%s2168_s10 + $0x48] sm:$0xff]  ;;  %v353_v52 = vld [vmem:[%s2168_s10 + $0x50] sm:$0xff] }
  0x2e   : > { %v367_v49 = vmul.f32 0.17677669, %v351_v48  ;;  %v368_v51 = vmul.f32 0.17677669, %v352_v50  ;;  %v369_v53 = vmul.f32 0.17677669, %v353_v52 }
  0x2f   : > { %1646 = vmatpush.xpose.msk.msra.mxu0 %vm407_vm0, %v386_v8  ;;  %v682_v54 = vld [vmem:[%s2210_s26] sm:$0xff]  ;;  %v683_v55 = vld [vmem:[%s2210_s26 + $0x8] sm:$0xff]  ;;  %v354_v60 = vld [vmem:[%s2168_s10 + $0x58] sm:$0xff] }
  0x30   : > { %1678 = vmatpush.xpose.msk.msra.mxu1 %vm407_vm0, %v402_v9  ;;  %vm714_vm1 = vcmp.eq.f32.partialorder %v682_v54, 0.0  ;;  %vm715_vm2 = vcmp.eq.f32.partialorder %v683_v55, 0.0  ;;  %v370_v62 = vmul.f32 0.17677669, %v354_v60  ;;  %v684_v63 = vld [vmem:[%s2210_s26 + $0x10] sm:$0xff]  ;;  %v685_v0 = vld [vmem:[%s2210_s26 + $0x18] sm:$0xff] }
  0x31   : > { %vm716_vm3 = vcmp.eq.f32.partialorder %v684_v63, 0.0  ;;  %vm717_vm4 = vcmp.eq.f32.partialorder %v685_v0, 0.0  ;;  %v355_v5 = vld [vmem:[%s2168_s10 + $0x60] sm:$0xff]  ;;  %v687_v9 = vld [vmem:[%s2210_s26 + $0x28] sm:$0xff]  ;;  %v693_v36 = vld [vmem:[%s2210_s26 + $0x58] sm:$0xff] }
  0x32   : > { %v371_v7 = vmul.f32 0.17677669, %v355_v5  ;;  %v686_v8 = vld [vmem:[%s2210_s26 + $0x20] sm:$0xff]  ;;  %vm719_vm6 = vcmp.eq.f32.partialorder %v687_v9, 0.0  ;;  %vm725_vm12 = vcmp.eq.f32.partialorder %v693_v36, 0.0  ;;  %v697_v50 = vld [vmem:[%s2210_s26 + $0x78] sm:$0xff] }
  0x33   : > { %1647 = vmatpush.xpose.msk.msra.mxu0 %vm407_vm0, %v385_v10  ;;  %vm718_vm5 = vcmp.eq.f32.partialorder %v686_v8, 0.0  ;;  %v694_v42 = vld [vmem:[%s2210_s26 + $0x60] sm:$0xff]  ;;  %v699_v9 = vld [vmem:[%s2210_s26 + $0x88] sm:$0xff] }
  0x34   : > { %1679 = vmatpush.xpose.msk.msra.mxu1 %vm407_vm0, %v401_v11  ;;  %vm726_vm13 = vcmp.eq.f32.partialorder %v694_v42, 0.0  ;;  %v698_v8 = vld [vmem:[%s2210_s26 + $0x80] sm:$0xff]  ;;  %v703_v36 = vld [vmem:[%s2210_s26 + $0xa8] sm:$0xff] }
  0x37   : > { %1648 = vmatpush.xpose.msk.msra.mxu0 %vm407_vm0, %v384_v12 }
  0x38   : > { %1680 = vmatpush.xpose.msk.msra.mxu1 %vm407_vm0, %v400_v13 }
  0x3b   : > { %1649 = vmatpush.xpose.msk.msra.mxu0 %vm407_vm0, %v383_v14  ;;  %v356_v14 = vld [vmem:[%s2168_s10 + $0x68] sm:$0xff] }
  0x3c   : > { %1681 = vmatpush.xpose.msk.msra.mxu1 %vm407_vm0, %v399_v15 }
  0x3f   : > { %1650 = vmatpush.xpose.msk.msra.mxu0 %vm407_vm0, %v382_v16  ;;  %v372_v16 = vmul.f32 0.17677669, %v356_v14 }
  0x40   : > { %1682 = vmatpush.xpose.msk.msra.mxu1 %vm407_vm0, %v398_v17  ;;  %v688_v17 = vld [vmem:[%s2210_s26 + $0x30] sm:$0xff] }
  0x41   : > { %vm720_vm7 = vcmp.eq.f32.partialorder %v688_v17, 0.0 }
  0x43   : > { %1651 = vmatpush.xpose.msk.msra.mxu0 %vm407_vm0, %v381_v18  ;;  %v689_v18 = vld [vmem:[%s2210_s26 + $0x38] sm:$0xff] }
  0x44   : > { %1683 = vmatpush.xpose.msk.msra.mxu1 %vm407_vm0, %v397_v19  ;;  %vm721_vm8 = vcmp.eq.f32.partialorder %v689_v18, 0.0  ;;  %v700_v18 = vld [vmem:[%s2210_s26 + $0x90] sm:$0xff] }
  0x47   : > { %1652 = vmatpush.xpose.msk.msra.mxu0 %vm407_vm0, %v380_v20 }
  0x48   : > { %1684 = vmatpush.xpose.msk.msra.mxu1 %vm407_vm0, %v396_v21 }
  0x4b   : > { %1653 = vmatpush.xpose.msk.msra.mxu0 %vm407_vm0, %v379_v22 }
  0x4c   : > { %1685 = vmatpush.xpose.msk.msra.mxu1 %vm407_vm0, %v395_v23  ;;  %v357_v23 = vld [vmem:[%s2168_s10 + $0x70] sm:$0xff] }
  0x4f   : > { %1654 = vmatpush.xpose.msk.msra.mxu0 %vm407_vm0, %v378_v24 }
  0x50   : > { %1686 = vmatpush.xpose.msk.msra.mxu1 %vm407_vm0, %v394_v25  ;;  %v373_v25 = vmul.f32 0.17677669, %v357_v23 }
  0x53   : > { %1655 = vmatpush.xpose.msk.msra.mxu0 %vm407_vm0, %v377_v26  ;;  %v690_v26 = vld [vmem:[%s2210_s26 + $0x40] sm:$0xff] }
  0x54   : > { %1687 = vmatpush.xpose.msk.msra.mxu1 %vm407_vm0, %v393_v27  ;;  %v691_v27 = vld [vmem:[%s2210_s26 + $0x48] sm:$0xff]  ;;  %vm722_vm9 = vcmp.eq.f32.partialorder %v690_v26, 0.0 }
  0x55   : > { %vm723_vm10 = vcmp.eq.f32.partialorder %v691_v27, 0.0 }
  0x57   : > { %1656 = vmatpush.xpose.msk.msra.mxu0 %vm407_vm0, %v376_v28  ;;  %v358_v28 = vld [vmem:[%s2168_s10 + $0x78] sm:$0xff]  ;;  %s2477_s10 = scalar_lea.vmem [#allocation2], %s1628_s13 }
  0x58   : > { %1688 = vmatpush.xpose.msk.msra.mxu1 %vm407_vm0, %v392_v29  ;;  %s1465_s14 = sshll.u32 %s2477_s10, 4  ;;  %s1466_s14 = int_to_ptr.vmem [resolvable:$true] %s1465_s14 }
  0x5b   : > { %1657 = vmatpush.xpose.msk.msra.mxu0 %vm407_vm0, %v375_v31  ;;  %v374_v31 = vmul.f32 0.17677669, %v358_v28 }
  0x5c   : > { %1689 = vmatpush.xpose.msk.msra.mxu1 %vm407_vm0, %v391_v32 }
  0x5e   : > { %1658 = vmatmul.msk.f32.vlgmr.msra.gmra.mxu0 %vm407_vm0, %v359_v33 }
  0x5f   : > { %1690 = vmatmul.msk.f32.vlgmr.msra.gmra.mxu1 %vm407_vm0, %v359_v33 }
  0x66   : > { %1659 = vmatmul.msk.f32.gmra.mxu0 %vm407_vm0, %v360_v35 }
  0x67   : > { %1691 = vmatmul.msk.f32.gmra.mxu1 %vm407_vm0, %v360_v35  ;;  %v692_v35 = vld [vmem:[%s2210_s26 + $0x50] sm:$0xff] }
  0x68   : > { %vm724_vm11 = vcmp.eq.f32.partialorder %v692_v35, 0.0  ;;  %v702_v35 = vld [vmem:[%s2210_s26 + $0xa0] sm:$0xff] }
  0x6e   : > { %1660 = vmatmul.msk.f32.gmra.mxu0 %vm407_vm0, %v361_v37 }
  0x6f   : > { %1692 = vmatmul.msk.f32.gmra.mxu1 %vm407_vm0, %v361_v37 }
  0x76   : > { %1661 = vmatmul.msk.f32.gmra.mxu0 %vm407_vm0, %v362_v39 }
  0x77   : > { %1693 = vmatmul.msk.f32.gmra.mxu1 %vm407_vm0, %v362_v39 }
  0x7e   : > { %1662 = vmatmul.msk.f32.gmra.mxu0 %vm407_vm0, %v363_v41 }
  0x7f   : > { %1694 = vmatmul.msk.f32.gmra.mxu1 %vm407_vm0, %v363_v41 }
  0x86   : > { %1663 = vmatmul.msk.f32.gmra.mxu0 %vm407_vm0, %v364_v43 }
  0x87   : > { %1695 = vmatmul.msk.f32.gmra.mxu1 %vm407_vm0, %v364_v43  ;;  %v695_v43 = vld [vmem:[%s2210_s26 + $0x68] sm:$0xff] }
  0x88   : > { %vm727_vm14 = vcmp.eq.f32.partialorder %v695_v43, 0.0 }
  0x8e   : > { %1664 = vmatmul.msk.f32.gmra.mxu0 %vm407_vm0, %v365_v45 }
  0x8f   : > { %1696 = vmatmul.msk.f32.gmra.mxu1 %vm407_vm0, %v365_v45 }
  0x96   : > { %1665 = vmatmul.msk.f32.gmra.mxu0 %vm407_vm0, %v366_v47 }
  0x97   : > { %1697 = vmatmul.msk.f32.gmra.mxu1 %vm407_vm0, %v366_v47 }
  0x9e   : > { %1666 = vmatmul.msk.f32.gmra.mxu0 %vm407_vm0, %v367_v49 }
  0x9f   : > { %1698 = vmatmul.msk.f32.gmra.mxu1 %vm407_vm0, %v367_v49  ;;  %v696_v49 = vld [vmem:[%s2210_s26 + $0x70] sm:$0xff] }
  0xa0   : > { %vm728_vm15 = vcmp.eq.f32.partialorder %v696_v49, 0.0 }
  0xa6   : > { %1667 = vmatmul.msk.f32.gmra.mxu0 %vm407_vm0, %v368_v51 }
  0xa7   : > { %1699 = vmatmul.msk.f32.gmra.mxu1 %vm407_vm0, %v368_v51 }
  0xae   : > { %1668 = vmatmul.msk.f32.gmra.mxu0 %vm407_vm0, %v369_v53 }
  0xaf   : > { %1700 = vmatmul.msk.f32.gmra.mxu1 %vm407_vm0, %v369_v53 }
  0xb6   : > { %1669 = vmatmul.msk.f32.gmra.mxu0 %vm407_vm0, %v370_v62 }
  0xb7   : > { %1701 = vmatmul.msk.f32.gmra.mxu1 %vm407_vm0, %v370_v62 }
  0xbe   : > { %1670 = vmatmul.msk.f32.gmra.mxu0 %vm407_vm0, %v371_v7 }
  0xbf   : > { %1702 = vmatmul.msk.f32.gmra.mxu1 %vm407_vm0, %v371_v7 }
  0xc6   : > { %1671 = vmatmul.msk.f32.gmra.mxu0 %vm407_vm0, %v372_v16 }
  0xc7   : > { %1703 = vmatmul.msk.f32.gmra.mxu1 %vm407_vm0, %v372_v16 }
  0xce   : > { %1672 = vmatmul.msk.f32.gmra.mxu0 %vm407_vm0, %v373_v25 }
  0xcf   : > { %1704 = vmatmul.msk.f32.gmra.mxu1 %vm407_vm0, %v373_v25 }
  0xd6   : > { %1673 = vmatmul.msk.f32.gmra.mxu0 %vm407_vm0, %v374_v31 }
  0xd7   : > { %1705 = vmatmul.msk.f32.gmra.mxu1 %vm407_vm0, %v374_v31 }
  0xdb   : > { %v569_v56 = vpop.f32.mrf.mxu0 }
  0xdc   : > { %v634_v57 = vpop.f32.mrf.mxu1  ;;  %v2217_v58 = vsel %vm714_vm1, -1e+09, %v569_v56  ;;  %vm729_vm1 = vcmp.eq.f32.partialorder %v697_v50, 0.0 }
  0xdd   : > { %v2219_v59 = vsel %vm715_vm2, -1e+09, %v634_v57  ;;  %vm730_vm2 = vcmp.eq.f32.partialorder %v698_v8, 0.0  ;;  %v707_v8 = vld [vmem:[%s2210_s26 + $0xc8] sm:$0xff] }
  0xde   : > { %v778_v61 = vmax.f32 %v2217_v58, %v2219_v59 }
  0xe0   : > { %779 = vmax.xlane.f32.xlu0 %v778_v61 }
  0xe3   : > { %v572_v1 = vpop.f32.mrf.mxu0 }
  0xe4   : > { %v637_v2 = vpop.f32.mrf.mxu1  ;;  %v2228_v3 = vsel %vm716_vm3, -1e+09, %v572_v1  ;;  %vm731_vm3 = vcmp.eq.f32.partialorder %v699_v9, 0.0 }
  0xe5   : > { %v2230_v4 = vsel %vm717_vm4, -1e+09, %v637_v2  ;;  %vm732_vm4 = vcmp.eq.f32.partialorder %v700_v18, 0.0 }
  0xe6   : > { %v781_v6 = vmax.f32 %v2228_v3, %v2230_v4 }
  0xe8   : > { %782 = vmax.xlane.f32.xlu0 %v781_v6 }
  0xeb   : > { %v575_v10 = vpop.f32.mrf.mxu0 }
  0xec   : > { %v640_v11 = vpop.f32.mrf.mxu1  ;;  %v2239_v12 = vsel %vm718_vm5, -1e+09, %v575_v10 }
  0xed   : > { %v2241_v13 = vsel %vm719_vm6, -1e+09, %v640_v11  ;;  %vm734_vm6 = vcmp.eq.f32.partialorder %v702_v35, 0.0  ;;  %v709_v35 = vld [vmem:[%s2210_s26 + $0xd8] sm:$0xff] }
  0xee   : > { %v784_v15 = vmax.f32 %v2239_v12, %v2241_v13 }
  0xf0   : > { %785 = vmax.xlane.f32.xlu1 %v784_v15 }
  0xf3   : > { %v578_v19 = vpop.f32.mrf.mxu0 }
  0xf4   : > { %v643_v20 = vpop.f32.mrf.mxu1  ;;  %v2250_v21 = vsel %vm720_vm7, -1e+09, %v578_v19  ;;  %v701_v19 = vld [vmem:[%s2210_s26 + $0x98] sm:$0xff]  ;;  %vm735_vm7 = vcmp.eq.f32.partialorder %v703_v36, 0.0 }
  0xf5   : > { %v2252_v22 = vsel %vm721_vm8, -1e+09, %v643_v20  ;;  %vm733_vm5 = vcmp.eq.f32.partialorder %v701_v19, 0.0 }
  0xf6   : > { %v787_v24 = vmax.f32 %v2250_v21, %v2252_v22 }
  0xf8   : > { %788 = vmax.xlane.f32.xlu1 %v787_v24 }
  0xfb   : > { %v581_v29 = vpop.f32.mrf.mxu0 }
  0xfc   : > { %v646_v30 = vpop.f32.mrf.mxu1  ;;  %v2262_v32 = vsel %vm722_vm9, -1e+09, %v581_v29 }
  0xfd   : > { %v2264_v33 = vsel %vm723_vm10, -1e+09, %v646_v30 }
  0xfe   : > { %v790_v34 = vmax.f32 %v2262_v32, %v2264_v33 }
 0x100   : > { %791 = vmax.xlane.f32.xlu2 %v790_v34 }
 0x103   : > { %v584_v37 = vpop.f32.mrf.mxu0 }
 0x104   : > { %v649_v38 = vpop.f32.mrf.mxu1  ;;  %v2272_v39 = vsel %vm724_vm11, -1e+09, %v584_v37  ;;  %vm739_vm11 = vcmp.eq.f32.partialorder %v707_v8, 0.0 }
 0x105   : > { %v2274_v40 = vsel %vm725_vm12, -1e+09, %v649_v38 }
 0x106   : > { %v793_v41 = vmax.f32 %v2272_v39, %v2274_v40 }
 0x108   : > { %794 = vmax.xlane.f32.xlu2 %v793_v41 }
 0x10b   : > { %v587_v44 = vpop.f32.mrf.mxu0 }
 0x10c   : > { %v652_v45 = vpop.f32.mrf.mxu1  ;;  %v2280_v46 = vsel %vm726_vm13, -1e+09, %v587_v44  ;;  %vm741_vm13 = vcmp.eq.f32.partialorder %v709_v35, 0.0  ;;  %v1282_v35 = vld [vmem:[%s2373_s9 + $0xc0] sm:$0xff] }
 0x10d   : > { %v2282_v47 = vsel %vm727_vm14, -1e+09, %v652_v45 }
 0x10e   : > { %v796_v48 = vmax.f32 %v2280_v46, %v2282_v47 }
 0x110   : > { %797 = vmax.xlane.f32.xlu0 %v796_v48 }
 0x113   : > { %v590_v51 = vpop.f32.mrf.mxu0 }
 0x114   : > { %v655_v52 = vpop.f32.mrf.mxu1  ;;  %v2288_v53 = vsel %vm728_vm15, -1e+09, %v590_v51 }
 0x115   : > { %v2290_v54 = vsel %vm729_vm1, -1e+09, %v655_v52  ;;  %v704_v52 = vld [vmem:[%s2210_s26 + $0xb0] sm:$0xff] }
 0x116   : > { %v799_v55 = vmax.f32 %v2288_v53, %v2290_v54  ;;  %vm736_vm8 = vcmp.eq.f32.partialorder %v704_v52, 0.0 }
 0x118   : > { %800 = vmax.xlane.f32.xlu2 %v799_v55  ;;  %v705_v55 = vld [vmem:[%s2210_s26 + $0xb8] sm:$0xff] }
 0x119   : > { %vm737_vm9 = vcmp.eq.f32.partialorder %v705_v55, 0.0 }
 0x11b   : > { %v593_v56 = vpop.f32.mrf.mxu0 }
 0x11c   : > { %v658_v57 = vpop.f32.mrf.mxu1 }
 0x11d   : > { %v2308_v15 = vsel %vm731_vm3, -1e+09, %v658_v57 }
 0x123   : > { %v596_v6 = vpop.f32.mrf.mxu0 }
 0x124   : > { %v661_v7 = vpop.f32.mrf.mxu1  ;;  %v2322_v29 = vsel %vm732_vm4, -1e+09, %v596_v6 }
 0x125   : > { %v2324_v30 = vsel %vm733_vm5, -1e+09, %v661_v7  ;;  %v706_v7 = vld [vmem:[%s2210_s26 + $0xc0] sm:$0xff] }
 0x126   : > { %v805_v42 = vmax.f32 %v2322_v29, %v2324_v30  ;;  %vm738_vm10 = vcmp.eq.f32.partialorder %v706_v7, 0.0 }
 0x12b   : > { %v599_v26 = vpop.f32.mrf.mxu0 }
 0x12c   : > { %v664_v27 = vpop.f32.mrf.mxu1  ;;  %v2338_v48 = vsel %vm734_vm6, -1e+09, %v599_v26 }
 0x12d   : > { %v2340_v49 = vsel %vm735_vm7, -1e+09, %v664_v27 }
 0x153   : > { %v780_v60 = vpop.xlane.xlu0 %779 }
 0x154   : > { %v826_v61 = vsub.f32 %v2217_v58, %v780_v60  ;;  %v827_v62 = vsub.f32 %v2219_v59, %v780_v60 }
 0x156   : > { %v858_v63 = vmul.f32 1.442695, %v826_v61  ;;  %v860_v0 = vmul.f32 1.442695, %v827_v62  ;;  %v808_v61 = vmax.f32 %v2338_v48, %v2340_v49 }
 0x158   : > { %1790 = vpow2.f32 %v858_v63 }
 0x159   : > { %1792 = vpow2.f32 %v860_v0 }
 0x15b   : > { %v783_v1 = vpop.xlane.xlu0 %782 }
 0x15c   : > { %v828_v2 = vsub.f32 %v2228_v3, %v783_v1  ;;  %v829_v5 = vsub.f32 %v2230_v4, %v783_v1  ;;  %v2306_v4 = vsel %vm730_vm2, -1e+09, %v593_v56 }
 0x15d   : > { %v802_v25 = vmax.f32 %v2306_v4, %v2308_v15 }
 0x15e   : > { %v2300_v10 = vpop.eup %1790  ;;  %v862_v58 = vmul.f32 1.442695, %v828_v2  ;;  %v864_v11 = vmul.f32 1.442695, %v829_v5 }
 0x15f   : > { %v2302_v59 = vpop.eup %1792 }
 0x160   : > { %1794 = vpow2.f32 %v862_v58  ;;  %v922_v14 = vadd.f32 %v2302_v59, %v2300_v10 }
 0x161   : > { %1796 = vpow2.f32 %v864_v11 }
 0x162   : > { %923 = vadd.xlane.f32.xlu1 %v922_v14 }
 0x163   : > { %v786_v3 = vpop.xlane.xlu1 %785 }
 0x164   : > { %v830_v16 = vsub.f32 %v2239_v12, %v786_v3  ;;  %v831_v17 = vsub.f32 %v2241_v13, %v786_v3 }
 0x166   : > { %v2314_v20 = vpop.eup %1794  ;;  %v866_v23 = vmul.f32 1.442695, %v830_v16  ;;  %v868_v24 = vmul.f32 1.442695, %v831_v17  ;;  %v1289_v16 = vld [vmem:[%s2373_s9 + $0xf8] sm:$0xff]  ;;  %v1272_v17 = vld [vmem:[%s2373_s9 + $0x70] sm:$0xff] }
 0x167   : > { %v2318_v28 = vpop.eup %1796  ;;  %1355 = vmatpush.msra.mxu3 %v1289_v16 }
 0x168   : > { %1798 = vpow2.f32 %v866_v23  ;;  %v925_v12 = vadd.f32 %v2318_v28, %v2314_v20 }
 0x169   : > { %1800 = vpow2.f32 %v868_v24  ;;  %v1288_v24 = vld [vmem:[%s2373_s9 + $0xf0] sm:$0xff] }
 0x16a   : > { %926 = vadd.xlane.f32.xlu0 %v925_v12  ;;  %803 = vmax.xlane.f32.xlu1 %v802_v25 }
 0x16b   : > { %v789_v13 = vpop.xlane.xlu1 %788  ;;  %1356 = vmatpush.msra.mxu3 %v1288_v24 }
 0x16c   : > { %v832_v31 = vsub.f32 %v2250_v21, %v789_v13  ;;  %v833_v34 = vsub.f32 %v2252_v22, %v789_v13  ;;  %v602_v21 = vpop.f32.mrf.mxu0  ;;  %v667_v22 = vpop.f32.mrf.mxu1  ;;  %v1271_v13 = vld [vmem:[%s2373_s9 + $0x68] sm:$0xff] }
 0x16d   : > { %v2354_v1 = vsel %vm736_vm8, -1e+09, %v602_v21  ;;  %v2356_v2 = vsel %vm737_vm9, -1e+09, %v667_v22  ;;  %v1269_v22 = vld [vmem:[%s2373_s9 + $0x58] sm:$0xff] }
 0x16e   : > { %v2330_v37 = vpop.eup %1798  ;;  %v870_v38 = vmul.f32 1.442695, %v832_v31  ;;  %v872_v41 = vmul.f32 1.442695, %v833_v34  ;;  %v811_v14 = vmax.f32 %v2354_v1, %v2356_v2  ;;  %v1287_v31 = vld [vmem:[%s2373_s9 + $0xe8] sm:$0xff]  ;;  %v708_v34 = vld [vmem:[%s2210_s26 + $0xd0] sm:$0xff] }
 0x16f   : > { %v2334_v43 = vpop.eup %1800  ;;  %1357 = vmatpush.msra.mxu3 %v1287_v31  ;;  %vm740_vm12 = vcmp.eq.f32.partialorder %v708_v34, 0.0  ;;  %v1283_v31 = vld [vmem:[%s2373_s9 + $0xc8] sm:$0xff]  ;;  %v1266_v34 = vld [vmem:[%s2373_s9 + $0x40] sm:$0xff] }
 0x170   : > { %1802 = vpow2.f32 %v870_v38  ;;  %v928_v44 = vadd.f32 %v2334_v43, %v2330_v37 }
 0x171   : > { %1804 = vpow2.f32 %v872_v41 }
 0x172   : > { %929 = vadd.xlane.f32.xlu2 %v928_v44  ;;  %806 = vmax.xlane.f32.xlu0 %v805_v42 }
 0x173   : > { %v792_v45 = vpop.xlane.xlu2 %791 }
 0x174   : > { %v834_v50 = vsub.f32 %v2262_v32, %v792_v45  ;;  %v835_v51 = vsub.f32 %v2264_v33, %v792_v45  ;;  %v605_v32 = vpop.f32.mrf.mxu0  ;;  %v670_v33 = vpop.f32.mrf.mxu1  ;;  %v1285_v45 = vld [vmem:[%s2373_s9 + $0xd8] sm:$0xff] }
 0x175   : > { %v2380_v19 = vsel %vm738_vm10, -1e+09, %v605_v32  ;;  %v2382_v23 = vsel %vm739_vm11, -1e+09, %v670_v33  ;;  %v711_v32 = vld [vmem:[%s2210_s26 + $0xe8] sm:$0xff] }
 0x176   : > { %v2346_v56 = vpop.eup %1802  ;;  %v874_v57 = vmul.f32 1.442695, %v834_v50  ;;  %v876_v60 = vmul.f32 1.442695, %v835_v51  ;;  %v814_v42 = vmax.f32 %v2380_v19, %v2382_v23  ;;  %v1268_v50 = vld [vmem:[%s2373_s9 + $0x50] sm:$0xff]  ;;  %vm743_vm15 = vcmp.eq.f32.partialorder %v711_v32, 0.0 }
 0x177   : > { %v2350_v62 = vpop.eup %1804  ;;  %v1284_v51 = vld [vmem:[%s2373_s9 + $0xd0] sm:$0xff]  ;;  %v1258_v32 = vld [vmem:[%s2373_s9] sm:$0xff] }
 0x178   : > { %1806 = vpow2.f32 %v874_v57  ;;  %v931_v63 = vadd.f32 %v2350_v62, %v2346_v56 }
 0x179   : > { %1808 = vpow2.f32 %v876_v60 }
 0x17a   : > { %932 = vadd.xlane.f32.xlu1 %v931_v63  ;;  %809 = vmax.xlane.f32.xlu2 %v808_v61  ;;  %v710_v63 = vld [vmem:[%s2210_s26 + $0xe0] sm:$0xff] }
 0x17b   : > { %v795_v0 = vpop.xlane.xlu2 %794  ;;  %vm742_vm14 = vcmp.eq.f32.partialorder %v710_v63, 0.0  ;;  %v1275_v63 = vld [vmem:[%s2373_s9 + $0x88] sm:$0xff] }
 0x17c   : > { %v836_v5 = vsub.f32 %v2272_v39, %v795_v0  ;;  %v837_v6 = vsub.f32 %v2274_v40, %v795_v0  ;;  %v1273_v40 = vld [vmem:[%s2373_s9 + $0x78] sm:$0xff]  ;;  %v608_v27 = vpop.f32.mrf.mxu0  ;;  %v673_v12 = vpop.f32.mrf.mxu1 }
 0x17d   : > { %1290 = vmatpush.msra.mxu2 %v1273_v40  ;;  %v2405_v55 = vsel %vm740_vm12, -1e+09, %v608_v27  ;;  %v2407_v57 = vsel %vm741_vm13, -1e+09, %v673_v12 }
 0x17e   : > { %v2362_v9 = vpop.eup %1806  ;;  %v878_v58 = vmul.f32 1.442695, %v836_v5  ;;  %v880_v11 = vmul.f32 1.442695, %v837_v6  ;;  %v817_v6 = vmax.f32 %v2405_v55, %v2407_v57 }
 0x17f   : > { %v2366_v3 = vpop.eup %1808  ;;  %1291 = vmatpush.msra.mxu2 %v1272_v17 }
 0x180   : > { %1810 = vpow2.f32 %v878_v58  ;;  %v934_v39 = vadd.f32 %v2366_v3, %v2362_v9 }
 0x181   : > { %1812 = vpow2.f32 %v880_v11  ;;  %1292 = vmatpush.msra.mxu2 %v1271_v13  ;;  %v1267_v13 = vld [vmem:[%s2373_s9 + $0x48] sm:$0xff] }
 0x182   : > { %935 = vadd.xlane.f32.xlu0 %v934_v39  ;;  %812 = vmax.xlane.f32.xlu1 %v811_v14  ;;  %v712_v14 = vld [vmem:[%s2210_s26 + $0xf0] sm:$0xff]  ;;  %v713_v39 = vld [vmem:[%s2210_s26 + $0xf8] sm:$0xff]  ;;  %s1462_s26 = sadd.s32 %s1716_s27, %s1709_s30  ;;  %s1906_s27 = scalar_lea.hbm %s2726_s5, 2048 }
 0x183   : > { %v798_v18 = vpop.xlane.xlu0 %797  ;;  %vm744_vm1 = vcmp.eq.f32.partialorder %v712_v14, 0.0  ;;  %vm745_vm2 = vcmp.eq.f32.partialorder %v713_v39, 0.0  ;;  %s1710_s17 = sshll.u32 %s1462_s26, 3 }
 0x184   : > { %v838_v25 = vsub.f32 %v2280_v46, %v798_v18  ;;  %v839_v26 = vsub.f32 %v2282_v47, %v798_v18  ;;  %v1270_v46 = vld [vmem:[%s2373_s9 + $0x60] sm:$0xff]  ;;  %v611_v7 = vpop.f32.mrf.mxu0  ;;  %v676_v8 = vpop.f32.mrf.mxu1  ;;  %s1464_s13 = scalar_lea.hbm %s2726_s5, %s1710_s17 }
 0x185   : > { %v1286_v47 = vld [vmem:[%s2373_s9 + $0xe0] sm:$0xff]  ;;  %1293 = vmatpush.msra.mxu2 %v1270_v46  ;;  %v2423_v11 = vsel %vm743_vm15, -1e+09, %v676_v8  ;;  %v1280_v46 = vld [vmem:[%s2373_s9 + $0xb0] sm:$0xff]  ;;  %s1467_s15 = sshll.u32 %s1464_s13, 4  ;;  %s1468_s15 = int_to_ptr.hbm [resolvable:$true] %s1467_s15 }
 0x186   : > { %v2391_v36 = vpop.eup %1810  ;;  %v882_v38 = vmul.f32 1.442695, %v838_v25  ;;  %v884_v41 = vmul.f32 1.442695, %v839_v26  ;;  %1358 = vmatpush.msra.mxu3 %v1286_v47  ;;  %v1263_v47 = vld [vmem:[%s2373_s9 + $0x28] sm:$0xff]  ;;  %s1900_s1 = sshra.s32 %s1468_s15, 4  ;;  %s1901_s1 = int_to_ptr.hbm [resolvable:$true] %s1900_s1 }
 0x187   : > { %v2397_v44 = vpop.eup %1812  ;;  %1294 = vmatpush.msra.mxu2 %v1269_v22  ;;  %v1262_v22 = vld [vmem:[%s2373_s9 + $0x20] sm:$0xff]  ;;  %s1902_s2 = scalar_lea.hbm %s1901_s1, 256  ;;  %p1907_p4 = scmp.lt.s32.totalorder %s1901_s1, %s2726_s5 }
 0x188   : > { %1814 = vpow2.f32 %v882_v38  ;;  %v937_v21 = vadd.f32 %v2397_v44, %v2391_v36  ;;  %1359 = vmatpush.msra.mxu3 %v1285_v45  ;;  %v1265_v38 = vld [vmem:[%s2373_s9 + $0x38] sm:$0xff]  ;;  %v1278_v45 = vld [vmem:[%s2373_s9 + $0xa0] sm:$0xff]  ;;  %p1903_p0 = scmp.ne.s32.totalorder %s1901_s1, %s1902_s2  ;;  %p1908_p5 = scmp.lt.s32.totalorder %s1906_s27, %s1902_s2 }
 0x189   : > { %1816 = vpow2.f32 %v884_v41  ;;  %1295 = vmatpush.msra.mxu2 %v1268_v50  ;;  %v1281_v41 = vld [vmem:[%s2373_s9 + $0xb8] sm:$0xff] }
 0x18a   : > { %938 = vadd.xlane.f32.xlu2 %v937_v21  ;;  %815 = vmax.xlane.f32.xlu0 %v814_v42  ;;  %v1264_v42 = vld [vmem:[%s2373_s9 + $0x30] sm:$0xff]  ;;  %v1279_v21 = vld [vmem:[%s2373_s9 + $0xa8] sm:$0xff]  ;;  %v1261_v50 = vld [vmem:[%s2373_s9 + $0x18] sm:$0xff]  ;;  %p1904_p1 = pnand %p1903_p0, %p2065_p3  ;;  %p1909_p6 = por %p1908_p5, %p1907_p4 }
 0x18b   : > { %v801_v52 = vpop.xlane.xlu2 %800  ;;  %1360 = vmatpush.msra.mxu3 %v1284_v51  ;;  %1296 = vmatpush.msra.mxu2 %v1267_v13  ;;  %v1277_v51 = vld [vmem:[%s2373_s9 + $0x98] sm:$0xff] }
 0x18c   : > { %v840_v60 = vsub.f32 %v2288_v53, %v801_v52  ;;  %v841_v61 = vsub.f32 %v2290_v54, %v801_v52  ;;  %v2421_v54 = vsel %vm742_vm14, -1e+09, %v611_v7  ;;  %v614_v24 = vpop.f32.mrf.mxu0  ;;  %v679_v25 = vpop.f32.mrf.mxu1  ;;  %v1260_v52 = vld [vmem:[%s2373_s9 + $0x10] sm:$0xff]  ;;  %p1905_p2 = pneg %p1904_p1 }
 0x18d   : > { %v820_v16 = vmax.f32 %v2421_v54, %v2423_v11  ;;  %v2435_v26 = vsel %vm744_vm1, -1e+09, %v614_v24  ;;  %v2437_v27 = vsel %vm745_vm2, -1e+09, %v679_v25  ;;  %1361 = vmatpush.msra.mxu3 %v1283_v31  ;;  %1297 = vmatpush.msra.mxu2 %v1266_v34 }
 0x18e   : > { %v2413_v33 = vpop.eup %1814  ;;  %v886_v0 = vmul.f32 1.442695, %v840_v60  ;;  %v888_v5 = vmul.f32 1.442695, %v841_v61  ;;  %v823_v12 = vmax.f32 %v2435_v26, %v2437_v27  ;;  %v1276_v60 = vld [vmem:[%s2373_s9 + $0x90] sm:$0xff]  ;;  %v1259_v61 = vld [vmem:[%s2373_s9 + $0x8] sm:$0xff]  ;;  %p1910_p7 = pnand %p1909_p6, %p1905_p2 }
 0x18f   : > { %v2417_v58 = vpop.eup %1816  ;;  %1362 = vmatpush.msra.mxu3 %v1282_v35  ;;  %1298 = vmatpush.msra.mxu2 %v1265_v38 }
 0x190   : > { %1818 = vpow2.f32 %v886_v0  ;;  %v940_v53 = vadd.f32 %v2417_v58, %v2413_v33  ;;  %v1274_v0 = vld [vmem:[%s2373_s9 + $0x80] sm:$0xff] }
 0x191   : > { %1820 = vpow2.f32 %v888_v5  ;;  %1363 = vmatpush.msra.mxu3 %v1281_v41  ;;  %1299 = vmatpush.msra.mxu2 %v1264_v42 }
 0x192   : > { %941 = vadd.xlane.f32.xlu1 %v940_v53  ;;  %818 = vmax.xlane.f32.xlu2 %v817_v6 }
 0x193   : > { %1364 = vmatpush.msra.mxu3 %v1280_v46  ;;  %1300 = vmatpush.msra.mxu2 %v1263_v47 }
 0x195   : > { %1365 = vmatpush.msra.mxu3 %v1279_v21  ;;  %1301 = vmatpush.msra.mxu2 %v1262_v22 }
 0x196   : > { %v2427_v40 = vpop.eup %1818 }
 0x197   : > { %v2431_v17 = vpop.eup %1820  ;;  %1366 = vmatpush.msra.mxu3 %v1278_v45  ;;  %1302 = vmatpush.msra.mxu2 %v1261_v50 }
 0x198   : > { %v943_v18 = vadd.f32 %v2431_v17, %v2427_v40 }
 0x199   : > { %1367 = vmatpush.msra.mxu3 %v1277_v51  ;;  %1303 = vmatpush.msra.mxu2 %v1260_v52 }
 0x19a   : > { %944 = vadd.xlane.f32.xlu0 %v943_v18  ;;  %821 = vmax.xlane.f32.xlu1 %v820_v16 }
 0x19b   : > { %1368 = vmatpush.msra.mxu3 %v1276_v60  ;;  %1304 = vmatpush.msra.mxu2 %v1259_v61 }
 0x19d   : > { %1369 = vmatpush.msra.mxu3 %v1275_v63  ;;  %1305 = vmatpush.msra.mxu2 %v1258_v32 }
 0x19f   : > { %1370 = vmatpush.msra.mxu3 %v1274_v0 }
 0x1a2   : > { %824 = vmax.xlane.f32.xlu0 %v823_v12 }
 0x1d5   : > { %v924_v5 = vpop.xlane.xlu1 %923 }
 0x1d6   : > { %1822 = vrcp.f32 %v924_v5  ;;  %v981_v25 = vand.u32 2147483648, %v924_v5  ;;  %v979_v13 = vand.u32 2147483647, %v924_v5  ;;  %vm975_vm4 = vweird.f32 %v924_v5 }
 0x1d8   : > { %v982_v35 = vor.u32 1.1754944e-38, %v981_v25  ;;  %vm980_vm6 = vcmp.eq.f32.partialorder %v979_v13, 8.507059e+37 }
 0x1dc   : > { %v1823_v6 = vpop.eup %1822 }
 0x1dd   : > { %v971_v7 = vmul.f32 %v1823_v6, %v924_v5  ;;  %v927_v8 = vpop.xlane.xlu0 %926  ;;  %v804_v53 = vpop.xlane.xlu1 %803  ;;  %vm976_vm3 = vweird.f32 %v1823_v6 }
 0x1de   : > { %1824 = vrcp.f32 %v927_v8  ;;  %v842_v14 = vsub.f32 %v2306_v4, %v804_v53  ;;  %v843_v39 = vsub.f32 %v2308_v15, %v804_v53  ;;  %vm977_vm5 = vmor %vm975_vm4, %vm976_vm3  ;;  %v995_v60 = vand.u32 2147483648, %v927_v8 }
 0x1df   : > { %v972_v16 = vsub.f32 1.0, %v971_v7  ;;  %vm989_vm8 = vweird.f32 %v927_v8 }
 0x1e0   : > { %v890_v18 = vmul.f32 1.442695, %v842_v14  ;;  %v892_v24 = vmul.f32 1.442695, %v843_v39  ;;  %v996_v32 = vor.u32 1.1754944e-38, %v995_v60 }
 0x1e1   : > { %v973_v12 = vmul.f32 %v1823_v6, %v972_v16 }
 0x1e2   : > { %1826 = vpow2.f32 %v890_v18 }
 0x1e3   : > { %1828 = vpow2.f32 %v892_v24  ;;  %v974_v31 = vadd.f32 %v1823_v6, %v973_v12 }
 0x1e4   : > { %v1825_v34 = vpop.eup %1824 }
 0x1e5   : > { %v985_v4 = vmul.f32 %v1825_v34, %v927_v8  ;;  %v2466_v38 = vpop.xlane.xlu2 %929  ;;  %v807_v15 = vpop.xlane.xlu0 %806  ;;  %v978_v41 = vsel %vm977_vm5, %v1823_v6, %v974_v31  ;;  %vm990_vm7 = vweird.f32 %v1825_v34 }
 0x1e6   : > { %1830 = vrcp.f32 %v2466_v38  ;;  %v844_v42 = vsub.f32 %v2322_v29, %v807_v15  ;;  %v845_v46 = vsub.f32 %v2324_v30, %v807_v15  ;;  %v983_v47 = vsel %vm980_vm6, %v982_v35, %v978_v41  ;;  %vm991_vm9 = vmor %vm989_vm8, %vm990_vm7 }
 0x1e7   : > { %v986_v21 = vsub.f32 1.0, %v985_v4  ;;  %v1194_v22 = vmul.f32 %v2300_v10, %v983_v47  ;;  %v1195_v45 = vmul.f32 %v2302_v59, %v983_v47  ;;  %v993_v29 = vand.u32 2147483647, %v927_v8 }
 0x1e8   : > { %v2473_v50 = vpop.eup %1826  ;;  %v894_v51 = vmul.f32 1.442695, %v844_v42  ;;  %v896_v52 = vmul.f32 1.442695, %v845_v46  ;;  %v1009_v13 = vand.u32 2147483648, %v2466_v38  ;;  %vm1003_vm12 = vweird.f32 %v2466_v38 }
 0x1e9   : > { %v2475_v61 = vpop.eup %1828  ;;  %v987_v63 = vmul.f32 %v1825_v34, %v986_v21  ;;  %1226 = vst [vmem:[%s2477_s10] sm:$0xff] %v1194_v22  ;;  %1306 = vmatmul.f32.vlgmr.msra.gmra.mxu2 %v1194_v22  ;;  %1371 = vmatmul.f32.vlgmr.msra.gmra.mxu3 %v1195_v45  ;;  %vm994_vm10 = vcmp.eq.f32.partialorder %v993_v29, 8.507059e+37 }
 0x1ea   : > { %1832 = vpow2.f32 %v894_v51  ;;  %1227 = vst [vmem:[%s2477_s10 + $0x8] sm:$0xff] %v1195_v45  ;;  %v946_v10 = vadd.f32 %v2475_v61, %v2473_v50  ;;  %v1010_v35 = vor.u32 1.1754944e-38, %v1009_v13 }
 0x1eb   : > { %1834 = vpow2.f32 %v896_v52  ;;  %v988_v59 = vadd.f32 %v1825_v34, %v987_v63 }
 0x1ec   : > { %v1831_v30 = vpop.eup %1830  ;;  %947 = vadd.xlane.f32.xlu2 %v946_v10 }
 0x1ed   : > { %v999_v0 = vmul.f32 %v1831_v30, %v2466_v38  ;;  %v2484_v5 = vpop.xlane.xlu1 %932  ;;  %v810_v6 = vpop.xlane.xlu2 %809  ;;  %v992_v7 = vsel %vm991_vm9, %v1825_v34, %v988_v59  ;;  %vm1004_vm11 = vweird.f32 %v1831_v30 }
 0x1ee   : > { %1836 = vrcp.f32 %v2484_v5  ;;  %v846_v53 = vsub.f32 %v2338_v48, %v810_v6  ;;  %v847_v14 = vsub.f32 %v2340_v49, %v810_v6  ;;  %v997_v39 = vsel %vm994_vm10, %v996_v32, %v992_v7  ;;  %vm1005_vm13 = vmor %vm1003_vm12, %vm1004_vm11 }
 0x1ef   : > { %v1000_v8 = vsub.f32 1.0, %v999_v0  ;;  %v1196_v16 = vmul.f32 %v2314_v20, %v997_v39  ;;  %v1197_v18 = vmul.f32 %v2318_v28, %v997_v39  ;;  %v1007_v48 = vand.u32 2147483647, %v2466_v38 }
 0x1f0   : > { %v2491_v24 = vpop.eup %1832  ;;  %v898_v25 = vmul.f32 1.442695, %v846_v53  ;;  %v900_v12 = vmul.f32 1.442695, %v847_v14  ;;  %v1023_v63 = vand.u32 2147483648, %v2484_v5  ;;  %vm1017_vm1 = vweird.f32 %v2484_v5 }
 0x1f1   : > { %v2494_v31 = vpop.eup %1834  ;;  %v1001_v34 = vmul.f32 %v1831_v30, %v1000_v8  ;;  %1228 = vst [vmem:[%s2477_s10 + $0x10] sm:$0xff] %v1196_v16  ;;  %1309 = vmatmul.f32.gmra.mxu2 %v1196_v16  ;;  %1374 = vmatmul.f32.gmra.mxu3 %v1197_v18  ;;  %vm1008_vm14 = vcmp.eq.f32.partialorder %v1007_v48, 8.507059e+37 }
 0x1f2   : > { %1838 = vpow2.f32 %v898_v25  ;;  %1229 = vst [vmem:[%s2477_s10 + $0x18] sm:$0xff] %v1197_v18  ;;  %v949_v20 = vadd.f32 %v2494_v31, %v2491_v24  ;;  %v1024_v59 = vor.u32 1.1754944e-38, %v1023_v63 }
 0x1f3   : > { %1840 = vpow2.f32 %v900_v12  ;;  %v1002_v28 = vadd.f32 %v1831_v30, %v1001_v34 }
 0x1f4   : > { %v1837_v49 = vpop.eup %1836  ;;  %950 = vadd.xlane.f32.xlu1 %v949_v20 }
 0x1f5   : > { %v1013_v4 = vmul.f32 %v1837_v49, %v2484_v5  ;;  %v2503_v15 = vpop.xlane.xlu0 %935  ;;  %v813_v41 = vpop.xlane.xlu1 %812  ;;  %v1006_v42 = vsel %vm1005_vm13, %v1831_v30, %v1002_v28  ;;  %vm1018_vm15 = vweird.f32 %v1837_v49 }
 0x1f6   : > { %1842 = vrcp.f32 %v2503_v15  ;;  %v848_v46 = vsub.f32 %v2354_v1, %v813_v41  ;;  %v849_v47 = vsub.f32 %v2356_v2, %v813_v41  ;;  %v1011_v21 = vsel %vm1008_vm14, %v1010_v35, %v1006_v42  ;;  %vm1019_vm2 = vmor %vm1017_vm1, %vm1018_vm15 }
 0x1f7   : > { %v1014_v38 = vsub.f32 1.0, %v1013_v4  ;;  %v1198_v22 = vmul.f32 %v2330_v37, %v1011_v21  ;;  %v1199_v45 = vmul.f32 %v2334_v43, %v1011_v21  ;;  %v1021_v1 = vand.u32 2147483647, %v2484_v5 }
 0x1f8   : > { %v2510_v51 = vpop.eup %1838  ;;  %v902_v52 = vmul.f32 1.442695, %v848_v46  ;;  %v904_v60 = vmul.f32 1.442695, %v849_v47  ;;  %v1037_v12 = vand.u32 2147483648, %v2503_v15  ;;  %vm1031_vm5 = vweird.f32 %v2503_v15 }
 0x1f9   : > { %v2513_v29 = vpop.eup %1840  ;;  %v1015_v10 = vmul.f32 %v1837_v49, %v1014_v38  ;;  %1230 = vst [vmem:[%s2477_s10 + $0x20] sm:$0xff] %v1198_v22  ;;  %1312 = vmatmul.f32.gmra.mxu2 %v1198_v22  ;;  %1377 = vmatmul.f32.gmra.mxu3 %v1199_v45  ;;  %vm1022_vm3 = vcmp.eq.f32.partialorder %v1021_v1, 8.507059e+37 }
 0x1fa   : > { %1844 = vpow2.f32 %v902_v52  ;;  %1231 = vst [vmem:[%s2477_s10 + $0x28] sm:$0xff] %v1199_v45  ;;  %v952_v37 = vadd.f32 %v2513_v29, %v2510_v51  ;;  %v1038_v48 = vor.u32 1.1754944e-38, %v1037_v12 }
 0x1fb   : > { %1846 = vpow2.f32 %v904_v60  ;;  %v1016_v43 = vadd.f32 %v1837_v49, %v1015_v10 }
 0x1fc   : > { %v1843_v2 = vpop.eup %1842  ;;  %953 = vadd.xlane.f32.xlu2 %v952_v37 }
 0x1fd   : > { %v1027_v30 = vmul.f32 %v1843_v2, %v2503_v15  ;;  %v2522_v32 = vpop.xlane.xlu2 %938  ;;  %v816_v0 = vpop.xlane.xlu0 %815  ;;  %v1020_v6 = vsel %vm1019_vm2, %v1837_v49, %v1016_v43  ;;  %vm1032_vm4 = vweird.f32 %v1843_v2 }
 0x1fe   : > { %1848 = vrcp.f32 %v2522_v32  ;;  %v850_v7 = vsub.f32 %v2380_v19, %v816_v0  ;;  %v851_v53 = vsub.f32 %v2382_v23, %v816_v0  ;;  %v1025_v14 = vsel %vm1022_vm3, %v1024_v59, %v1020_v6  ;;  %vm1033_vm6 = vmor %vm1031_vm5, %vm1032_vm4 }
 0x1ff   : > { %v1028_v5 = vsub.f32 1.0, %v1027_v30  ;;  %v1200_v39 = vmul.f32 %v2346_v56, %v1025_v14  ;;  %v1201_v8 = vmul.f32 %v2350_v62, %v1025_v14  ;;  %v1035_v19 = vand.u32 2147483647, %v2503_v15 }
 0x200   : > { %v2529_v16 = vpop.eup %1844  ;;  %v906_v18 = vmul.f32 1.442695, %v850_v7  ;;  %v908_v25 = vmul.f32 1.442695, %v851_v53  ;;  %v1051_v45 = vand.u32 2147483648, %v2522_v32  ;;  %vm1045_vm9 = vweird.f32 %v2522_v32 }
 0x201   : > { %v2532_v13 = vpop.eup %1846  ;;  %v1029_v34 = vmul.f32 %v1843_v2, %v1028_v5  ;;  %1232 = vst [vmem:[%s2477_s10 + $0x30] sm:$0xff] %v1200_v39  ;;  %1315 = vmatmul.f32.gmra.mxu2 %v1200_v39  ;;  %1380 = vmatmul.f32.gmra.mxu3 %v1201_v8  ;;  %vm1036_vm7 = vcmp.eq.f32.partialorder %v1035_v19, 8.507059e+37 }
 0x202   : > { %1850 = vpow2.f32 %v906_v18  ;;  %1233 = vst [vmem:[%s2477_s10 + $0x38] sm:$0xff] %v1201_v8  ;;  %v955_v56 = vadd.f32 %v2532_v13, %v2529_v16  ;;  %v1052_v63 = vor.u32 1.1754944e-38, %v1051_v45 }
 0x203   : > { %1852 = vpow2.f32 %v908_v25  ;;  %v1030_v62 = vadd.f32 %v1843_v2, %v1029_v34 }
 0x204   : > { %v1849_v23 = vpop.eup %1848  ;;  %956 = vadd.xlane.f32.xlu0 %v955_v56 }
 0x205   : > { %v1041_v20 = vmul.f32 %v1849_v23, %v2522_v32  ;;  %v2541_v28 = vpop.xlane.xlu1 %941  ;;  %v819_v49 = vpop.xlane.xlu2 %818  ;;  %v1034_v35 = vsel %vm1033_vm6, %v1843_v2, %v1030_v62  ;;  %vm1046_vm8 = vweird.f32 %v1849_v23 }
 0x206   : > { %1854 = vrcp.f32 %v2541_v28  ;;  %v852_v4 = vsub.f32 %v2405_v55, %v819_v49  ;;  %v853_v41 = vsub.f32 %v2407_v57, %v819_v49  ;;  %v1039_v42 = vsel %vm1036_vm7, %v1038_v48, %v1034_v35  ;;  %vm1047_vm10 = vmor %vm1045_vm9, %vm1046_vm8 }
 0x207   : > { %v1042_v15 = vsub.f32 1.0, %v1041_v20  ;;  %v1202_v46 = vmul.f32 %v2362_v9, %v1039_v42  ;;  %v1203_v47 = vmul.f32 %v2366_v3, %v1039_v42  ;;  %v1049_v55 = vand.u32 2147483647, %v2522_v32 }
 0x208   : > { %v2548_v21 = vpop.eup %1850  ;;  %v910_v38 = vmul.f32 1.442695, %v852_v4  ;;  %v912_v22 = vmul.f32 1.442695, %v853_v41  ;;  %v1065_v5 = vand.u32 2147483648, %v2541_v28  ;;  %vm1059_vm13 = vweird.f32 %v2541_v28 }
 0x209   : > { %v2551_v52 = vpop.eup %1852  ;;  %v1043_v60 = vmul.f32 %v1849_v23, %v1042_v15  ;;  %1234 = vst [vmem:[%s2477_s10 + $0x40] sm:$0xff] %v1202_v46  ;;  %1318 = vmatmul.f32.gmra.mxu2 %v1202_v46  ;;  %1383 = vmatmul.f32.gmra.mxu3 %v1203_v47  ;;  %vm1050_vm11 = vcmp.eq.f32.partialorder %v1049_v55, 8.507059e+37 }
 0x20a   : > { %1856 = vpow2.f32 %v910_v38  ;;  %1235 = vst [vmem:[%s2477_s10 + $0x48] sm:$0xff] %v1203_v47  ;;  %v958_v9 = vadd.f32 %v2551_v52, %v2548_v21  ;;  %v1066_v18 = vor.u32 1.1754944e-38, %v1065_v5 }
 0x20b   : > { %1858 = vpow2.f32 %v912_v22  ;;  %v1044_v3 = vadd.f32 %v1849_v23, %v1043_v60 }
 0x20c   : > { %v1855_v57 = vpop.eup %1854  ;;  %959 = vadd.xlane.f32.xlu1 %v958_v9 }
 0x20d   : > { %v1055_v10 = vmul.f32 %v1855_v57, %v2541_v28  ;;  %v2560_v1 = vpop.xlane.xlu0 %944  ;;  %v822_v37 = vpop.xlane.xlu1 %821  ;;  %v1048_v43 = vsel %vm1047_vm10, %v1849_v23, %v1044_v3  ;;  %vm1060_vm12 = vweird.f32 %v1855_v57 }
 0x20e   : > { %1860 = vrcp.f32 %v2560_v1  ;;  %v854_v2 = vsub.f32 %v2421_v54, %v822_v37  ;;  %v855_v59 = vsub.f32 %v2423_v11, %v822_v37  ;;  %v1053_v30 = vsel %vm1050_vm11, %v1052_v63, %v1048_v43  ;;  %vm1061_vm14 = vmor %vm1059_vm13, %vm1060_vm12 }
 0x20f   : > { %v1056_v32 = vsub.f32 1.0, %v1055_v10  ;;  %v1204_v0 = vmul.f32 %v2391_v36, %v1053_v30  ;;  %v1205_v6 = vmul.f32 %v2397_v44, %v1053_v30  ;;  %v1063_v54 = vand.u32 2147483647, %v2541_v28 }
 0x210   : > { %v2567_v7 = vpop.eup %1856  ;;  %v914_v53 = vmul.f32 1.442695, %v854_v2  ;;  %v916_v14 = vmul.f32 1.442695, %v855_v59  ;;  %v1079_v4 = vand.u32 2147483648, %v2560_v1  ;;  %vm1073_vm2 = vweird.f32 %v2560_v1 }
 0x211   : > { %v2570_v39 = vpop.eup %1858  ;;  %v1057_v8 = vmul.f32 %v1855_v57, %v1056_v32  ;;  %1236 = vst [vmem:[%s2477_s10 + $0x50] sm:$0xff] %v1204_v0  ;;  %1321 = vmatmul.f32.gmra.mxu2 %v1204_v0  ;;  %1386 = vmatmul.f32.gmra.mxu3 %v1205_v6  ;;  %vm1064_vm15 = vcmp.eq.f32.partialorder %v1063_v54, 8.507059e+37 }
 0x212   : > { %1862 = vpow2.f32 %v914_v53  ;;  %1237 = vst [vmem:[%s2477_s10 + $0x58] sm:$0xff] %v1205_v6  ;;  %v961_v36 = vadd.f32 %v2570_v39, %v2567_v7 }
 0x213   : > { %1864 = vpow2.f32 %v916_v14  ;;  %v1058_v44 = vadd.f32 %v1855_v57, %v1057_v8 }
 0x214   : > { %v1861_v11 = vpop.eup %1860  ;;  %962 = vadd.xlane.f32.xlu2 %v961_v36 }
 0x215   : > { %v1069_v25 = vmul.f32 %v1861_v11, %v2560_v1  ;;  %v825_v12 = vpop.xlane.xlu0 %824  ;;  %v1062_v34 = vsel %vm1061_vm14, %v1855_v57, %v1058_v44  ;;  %vm1074_vm1 = vweird.f32 %v1861_v11 }
 0x216   : > { %v856_v19 = vsub.f32 %v2435_v26, %v825_v12  ;;  %v857_v56 = vsub.f32 %v2437_v27, %v825_v12  ;;  %v1067_v62 = vsel %vm1064_vm15, %v1066_v18, %v1062_v34  ;;  %v1077_v26 = vand.u32 2147483647, %v2560_v1  ;;  %vm1075_vm3 = vmor %vm1073_vm2, %vm1074_vm1 }
 0x217   : > { %v1070_v23 = vsub.f32 1.0, %v1069_v25  ;;  %v1206_v48 = vmul.f32 %v2413_v33, %v1067_v62  ;;  %v1207_v20 = vmul.f32 %v2417_v58, %v1067_v62  ;;  %v1080_v27 = vor.u32 1.1754944e-38, %v1079_v4 }
 0x218   : > { %v2583_v28 = vpop.eup %1862  ;;  %v918_v49 = vmul.f32 1.442695, %v856_v19  ;;  %v920_v35 = vmul.f32 1.442695, %v857_v56  ;;  %vm1078_vm4 = vcmp.eq.f32.partialorder %v1077_v26, 8.507059e+37 }
 0x219   : > { %v2586_v41 = vpop.eup %1864  ;;  %v1071_v42 = vmul.f32 %v1861_v11, %v1070_v23  ;;  %1238 = vst [vmem:[%s2477_s10 + $0x60] sm:$0xff] %v1206_v48  ;;  %1324 = vmatmul.f32.gmra.mxu2 %v1206_v48  ;;  %1389 = vmatmul.f32.gmra.mxu3 %v1207_v20 }
 0x21a   : > { %1866 = vpow2.f32 %v918_v49  ;;  %1239 = vst [vmem:[%s2477_s10 + $0x68] sm:$0xff] %v1207_v20  ;;  %v964_v33 = vadd.f32 %v2586_v41, %v2583_v28 }
 0x21b   : > { %1868 = vpow2.f32 %v920_v35  ;;  %v1072_v58 = vadd.f32 %v1861_v11, %v1071_v42 }
 0x21c   : > { %965 = vadd.xlane.f32.xlu0 %v964_v33 }
 0x21d   : > { %v1076_v15 = vsel %vm1075_vm3, %v1861_v11, %v1072_v58 }
 0x21e   : > { %v1081_v46 = vsel %vm1078_vm4, %v1080_v27, %v1076_v15 }
 0x21f   : > { %v1208_v47 = vmul.f32 %v2427_v40, %v1081_v46  ;;  %v1209_v38 = vmul.f32 %v2431_v17, %v1081_v46 }
 0x220   : > { %v2596_v22 = vpop.eup %1866 }
 0x221   : > { %v2598_v45 = vpop.eup %1868  ;;  %1240 = vst [vmem:[%s2477_s10 + $0x70] sm:$0xff] %v1208_v47  ;;  %1327 = vmatmul.f32.gmra.mxu2 %v1208_v47  ;;  %1392 = vmatmul.f32.gmra.mxu3 %v1209_v38 }
 0x222   : > { %1241 = vst [vmem:[%s2477_s10 + $0x78] sm:$0xff] %v1209_v38  ;;  %v967_v60 = vadd.f32 %v2598_v45, %v2596_v22 }
 0x224   : > { %968 = vadd.xlane.f32.xlu1 %v967_v60 }
 0x25f   : > { %v948_v55 = vpop.xlane.xlu2 %947 }
 0x260   : > { %1870 = vrcp.f32 %v948_v55  ;;  %v1093_v57 = vand.u32 2147483648, %v948_v55  ;;  %v1091_v10 = vand.u32 2147483647, %v948_v55  ;;  %vm1087_vm6 = vweird.f32 %v948_v55 }
 0x262   : > { %v1094_v30 = vor.u32 1.1754944e-38, %v1093_v57  ;;  %vm1092_vm8 = vcmp.eq.f32.partialorder %v1091_v10, 8.507059e+37 }
 0x266   : > { %v1871_v9 = vpop.eup %1870 }
 0x267   : > { %v1083_v3 = vmul.f32 %v1871_v9, %v948_v55  ;;  %v951_v40 = vpop.xlane.xlu1 %950  ;;  %vm1088_vm5 = vweird.f32 %v1871_v9 }
 0x268   : > { %1872 = vrcp.f32 %v951_v40  ;;  %vm1089_vm7 = vmor %vm1087_vm6, %vm1088_vm5  ;;  %v1107_v54 = vand.u32 2147483648, %v951_v40  ;;  %v1105_v44 = vand.u32 2147483647, %v951_v40  ;;  %vm1101_vm10 = vweird.f32 %v951_v40 }
 0x269   : > { %v1084_v17 = vsub.f32 1.0, %v1083_v3 }
 0x26a   : > { %vm1106_vm12 = vcmp.eq.f32.partialorder %v1105_v44, 8.507059e+37 }
 0x26b   : > { %v1085_v63 = vmul.f32 %v1871_v9, %v1084_v17 }
 0x26c   : > { %v1307_v1 = vpop.f32.mrf.mxu2  ;;  %v1372_v37 = vpop.f32.mrf.mxu3 }
 0x26d   : > { %v1373_v43 = vadd.f32 %v1372_v37, %v1307_v1  ;;  %v1086_v2 = vadd.f32 %v1871_v9, %v1085_v63 }
 0x26e   : > { %v1873_v59 = vpop.eup %1872 }
 0x26f   : > { %v1097_v32 = vmul.f32 %v1873_v59, %v951_v40  ;;  %1420 = vst.msk [vmem:[%s2609_s16] sm:$0xff] %vm407_vm0, %v1373_v43  ;;  %v954_v0 = vpop.xlane.xlu2 %953  ;;  %v1090_v6 = vsel %vm1089_vm7, %v1871_v9, %v1086_v2  ;;  %vm1102_vm9 = vweird.f32 %v1873_v59 }
 0x270   : > { %1874 = vrcp.f32 %v954_v0  ;;  %v1095_v53 = vsel %vm1092_vm8, %v1094_v30, %v1090_v6  ;;  %vm1103_vm11 = vmor %vm1101_vm10, %vm1102_vm9  ;;  %v1121_v49 = vand.u32 2147483648, %v954_v0  ;;  %v1119_v4 = vand.u32 2147483647, %v954_v0 }
 0x271   : > { %v1098_v14 = vsub.f32 1.0, %v1097_v32  ;;  %v1210_v5 = vmul.f32 %v2473_v50, %v1095_v53  ;;  %v1211_v8 = vmul.f32 %v2475_v61, %v1095_v53  ;;  %v1108_v50 = vor.u32 1.1754944e-38, %v1107_v54 }
 0x272   : > { %vm1115_vm14 = vweird.f32 %v954_v0  ;;  %vm1120_vm1 = vcmp.eq.f32.partialorder %v1119_v4, 8.507059e+37 }
 0x273   : > { %v1099_v36 = vmul.f32 %v1873_v59, %v1098_v14  ;;  %1242 = vst [vmem:[%s2477_s10 + $0x80] sm:$0xff] %v1210_v5  ;;  %1330 = vmatmul.f32.gmra.mxu2 %v1210_v5  ;;  %1395 = vmatmul.f32.gmra.mxu3 %v1211_v8 }
 0x274   : > { %1243 = vst [vmem:[%s2477_s10 + $0x88] sm:$0xff] %v1211_v8  ;;  %v1310_v11 = vpop.f32.mrf.mxu2  ;;  %v1375_v18 = vpop.f32.mrf.mxu3 }
 0x275   : > { %v1376_v25 = vadd.f32 %v1375_v18, %v1310_v11  ;;  %v1100_v12 = vadd.f32 %v1873_v59, %v1099_v36 }
 0x276   : > { %v1875_v34 = vpop.eup %1874 }
 0x277   : > { %v1111_v19 = vmul.f32 %v1875_v34, %v954_v0  ;;  %1421 = vst.msk [vmem:[%s2609_s16 + $0x8] sm:$0xff] %vm407_vm0, %v1376_v25  ;;  %v957_v61 = vpop.xlane.xlu0 %956  ;;  %v1104_v56 = vsel %vm1103_vm11, %v1873_v59, %v1100_v12  ;;  %vm1116_vm13 = vweird.f32 %v1875_v34 }
 0x278   : > { %1876 = vrcp.f32 %v957_v61  ;;  %v1109_v62 = vsel %vm1106_vm12, %v1108_v50, %v1104_v56  ;;  %vm1117_vm15 = vmor %vm1115_vm14, %vm1116_vm13  ;;  %v1135_v9 = vand.u32 2147483648, %v957_v61  ;;  %v1133_v40 = vand.u32 2147483647, %v957_v61 }
 0x279   : > { %v1112_v23 = vsub.f32 1.0, %v1111_v19  ;;  %v1212_v48 = vmul.f32 %v2491_v24, %v1109_v62  ;;  %v1213_v20 = vmul.f32 %v2494_v31, %v1109_v62  ;;  %v1122_v24 = vor.u32 1.1754944e-38, %v1121_v49 }
 0x27a   : > { %vm1129_vm3 = vweird.f32 %v957_v61  ;;  %vm1134_vm5 = vcmp.eq.f32.partialorder %v1133_v40, 8.507059e+37 }
 0x27b   : > { %v1113_v35 = vmul.f32 %v1875_v34, %v1112_v23  ;;  %1244 = vst [vmem:[%s2477_s10 + $0x90] sm:$0xff] %v1212_v48  ;;  %1333 = vmatmul.f32.gmra.mxu2 %v1212_v48  ;;  %1398 = vmatmul.f32.gmra.mxu3 %v1213_v20 }
 0x27c   : > { %1245 = vst [vmem:[%s2477_s10 + $0x98] sm:$0xff] %v1213_v20  ;;  %v1313_v42 = vpop.f32.mrf.mxu2  ;;  %v1378_v26 = vpop.f32.mrf.mxu3 }
 0x27d   : > { %v1379_v33 = vadd.f32 %v1378_v26, %v1313_v42  ;;  %v1114_v58 = vadd.f32 %v1875_v34, %v1113_v35 }
 0x27e   : > { %v1877_v27 = vpop.eup %1876 }
 0x27f   : > { %v1125_v15 = vmul.f32 %v1877_v27, %v957_v61  ;;  %1422 = vst.msk [vmem:[%s2609_s16 + $0x10] sm:$0xff] %vm407_vm0, %v1379_v33  ;;  %v960_v31 = vpop.xlane.xlu1 %959  ;;  %v1118_v46 = vsel %vm1117_vm15, %v1875_v34, %v1114_v58  ;;  %vm1130_vm2 = vweird.f32 %v1877_v27 }
 0x280   : > { %1878 = vrcp.f32 %v960_v31  ;;  %v1123_v47 = vsel %vm1120_vm1, %v1122_v24, %v1118_v46  ;;  %vm1131_vm4 = vmor %vm1129_vm3, %vm1130_vm2  ;;  %v1149_v0 = vand.u32 2147483648, %v960_v31  ;;  %v1147_v53 = vand.u32 2147483647, %v960_v31 }
 0x281   : > { %v1126_v38 = vsub.f32 1.0, %v1125_v15  ;;  %v1214_v60 = vmul.f32 %v2510_v51, %v1123_v47  ;;  %v1215_v55 = vmul.f32 %v2513_v29, %v1123_v47  ;;  %v1136_v51 = vor.u32 1.1754944e-38, %v1135_v9 }
 0x282   : > { %vm1143_vm7 = vweird.f32 %v960_v31  ;;  %vm1148_vm9 = vcmp.eq.f32.partialorder %v1147_v53, 8.507059e+37 }
 0x283   : > { %v1127_v3 = vmul.f32 %v1877_v27, %v1126_v38  ;;  %1246 = vst [vmem:[%s2477_s10 + $0xa0] sm:$0xff] %v1214_v60  ;;  %1336 = vmatmul.f32.gmra.mxu2 %v1214_v60  ;;  %1401 = vmatmul.f32.gmra.mxu3 %v1215_v55 }
 0x284   : > { %1247 = vst [vmem:[%s2477_s10 + $0xa8] sm:$0xff] %v1215_v55  ;;  %v1316_v17 = vpop.f32.mrf.mxu2  ;;  %v1381_v57 = vpop.f32.mrf.mxu3 }
 0x285   : > { %v1382_v63 = vadd.f32 %v1381_v57, %v1316_v17  ;;  %v1128_v10 = vadd.f32 %v1877_v27, %v1127_v3 }
 0x286   : > { %v1879_v1 = vpop.eup %1878 }
 0x287   : > { %v1139_v37 = vmul.f32 %v1879_v1, %v960_v31  ;;  %1423 = vst.msk [vmem:[%s2609_s16 + $0x18] sm:$0xff] %vm407_vm0, %v1382_v63  ;;  %v963_v29 = vpop.xlane.xlu2 %962  ;;  %v1132_v43 = vsel %vm1131_vm4, %v1877_v27, %v1128_v10  ;;  %vm1144_vm6 = vweird.f32 %v1879_v1 }
 0x288   : > { %1880 = vrcp.f32 %v963_v29  ;;  %v1137_v2 = vsel %vm1134_vm5, %v1136_v51, %v1132_v43  ;;  %vm1145_vm8 = vmor %vm1143_vm7, %vm1144_vm6  ;;  %v1163_v50 = vand.u32 2147483648, %v963_v29  ;;  %v1161_v61 = vand.u32 2147483647, %v963_v29 }
 0x289   : > { %v1140_v59 = vsub.f32 1.0, %v1139_v37  ;;  %v1216_v30 = vmul.f32 %v2529_v16, %v1137_v2  ;;  %v1217_v32 = vmul.f32 %v2532_v13, %v1137_v2  ;;  %v1150_v16 = vor.u32 1.1754944e-38, %v1149_v0 }
 0x28a   : > { %vm1157_vm11 = vweird.f32 %v963_v29  ;;  %vm1162_vm13 = vcmp.eq.f32.partialorder %v1161_v61, 8.507059e+37 }
 0x28b   : > { %v1141_v6 = vmul.f32 %v1879_v1, %v1140_v59  ;;  %1248 = vst [vmem:[%s2477_s10 + $0xb0] sm:$0xff] %v1216_v30  ;;  %1339 = vmatmul.f32.gmra.mxu2 %v1216_v30  ;;  %1404 = vmatmul.f32.gmra.mxu3 %v1217_v32 }
 0x28c   : > { %1249 = vst [vmem:[%s2477_s10 + $0xb8] sm:$0xff] %v1217_v32  ;;  %v1319_v14 = vpop.f32.mrf.mxu2  ;;  %v1384_v5 = vpop.f32.mrf.mxu3 }
 0x28d   : > { %v1385_v8 = vadd.f32 %v1384_v5, %v1319_v14  ;;  %v1142_v54 = vadd.f32 %v1879_v1, %v1141_v6 }
 0x28e   : > { %v1881_v36 = vpop.eup %1880 }
 0x28f   : > { %v1153_v44 = vmul.f32 %v1881_v36, %v963_v29  ;;  %1424 = vst.msk [vmem:[%s2609_s16 + $0x20] sm:$0xff] %vm407_vm0, %v1385_v8  ;;  %v966_v13 = vpop.xlane.xlu0 %965  ;;  %v1146_v11 = vsel %vm1145_vm8, %v1879_v1, %v1142_v54  ;;  %vm1158_vm10 = vweird.f32 %v1881_v36 }
 0x290   : > { %1882 = vrcp.f32 %v966_v13  ;;  %v1151_v18 = vsel %vm1148_vm9, %v1150_v16, %v1146_v11  ;;  %vm1159_vm12 = vmor %vm1157_vm11, %vm1158_vm10  ;;  %v1177_v58 = vand.u32 2147483648, %v966_v13  ;;  %v1175_v24 = vand.u32 2147483647, %v966_v13 }
 0x291   : > { %v1154_v25 = vsub.f32 1.0, %v1153_v44  ;;  %v1218_v12 = vmul.f32 %v2548_v21, %v1151_v18  ;;  %v1219_v34 = vmul.f32 %v2551_v52, %v1151_v18  ;;  %v1164_v21 = vor.u32 1.1754944e-38, %v1163_v50 }
 0x292   : > { %vm1171_vm15 = vweird.f32 %v966_v13  ;;  %vm1176_vm2 = vcmp.eq.f32.partialorder %v1175_v24, 8.507059e+37 }
 0x293   : > { %v1155_v19 = vmul.f32 %v1881_v36, %v1154_v25  ;;  %1250 = vst [vmem:[%s2477_s10 + $0xc0] sm:$0xff] %v1218_v12  ;;  %1342 = vmatmul.f32.gmra.mxu2 %v1218_v12  ;;  %1407 = vmatmul.f32.gmra.mxu3 %v1219_v34 }
 0x294   : > { %1251 = vst [vmem:[%s2477_s10 + $0xc8] sm:$0xff] %v1219_v34  ;;  %v1322_v56 = vpop.f32.mrf.mxu2  ;;  %v1387_v62 = vpop.f32.mrf.mxu3 }
 0x295   : > { %v1388_v23 = vadd.f32 %v1387_v62, %v1322_v56  ;;  %v1156_v48 = vadd.f32 %v1881_v36, %v1155_v19 }
 0x296   : > { %v1883_v20 = vpop.eup %1882 }
 0x297   : > { %v1167_v49 = vmul.f32 %v1883_v20, %v966_v13  ;;  %1425 = vst.msk [vmem:[%s2609_s16 + $0x28] sm:$0xff] %vm407_vm0, %v1388_v23  ;;  %v969_v52 = vpop.xlane.xlu1 %968  ;;  %v1160_v35 = vsel %vm1159_vm12, %v1881_v36, %v1156_v48  ;;  %vm1172_vm14 = vweird.f32 %v1883_v20 }
 0x298   : > { %1884 = vrcp.f32 %v969_v52  ;;  %v1165_v4 = vsel %vm1162_vm13, %v1164_v21, %v1160_v35  ;;  %vm1173_vm1 = vmor %vm1171_vm15, %vm1172_vm14  ;;  %v1191_v17 = vand.u32 2147483648, %v969_v52  ;;  %v1189_v63 = vand.u32 2147483647, %v969_v52 }
 0x299   : > { %v1168_v42 = vsub.f32 1.0, %v1167_v49  ;;  %v1220_v26 = vmul.f32 %v2567_v7, %v1165_v4  ;;  %v1221_v33 = vmul.f32 %v2570_v39, %v1165_v4  ;;  %v1178_v7 = vor.u32 1.1754944e-38, %v1177_v58 }
 0x29a   : > { %vm1185_vm4 = vweird.f32 %v969_v52  ;;  %vm1190_vm6 = vcmp.eq.f32.partialorder %v1189_v63, 8.507059e+37 }
 0x29b   : > { %v1169_v27 = vmul.f32 %v1883_v20, %v1168_v42  ;;  %1252 = vst [vmem:[%s2477_s10 + $0xd0] sm:$0xff] %v1220_v26  ;;  %1345 = vmatmul.f32.gmra.mxu2 %v1220_v26  ;;  %1410 = vmatmul.f32.gmra.mxu3 %v1221_v33 }
 0x29c   : > { %1253 = vst [vmem:[%s2477_s10 + $0xd8] sm:$0xff] %v1221_v33  ;;  %v1325_v15 = vpop.f32.mrf.mxu2  ;;  %v1390_v31 = vpop.f32.mrf.mxu3 }
 0x29d   : > { %v1391_v46 = vadd.f32 %v1390_v31, %v1325_v15  ;;  %v1170_v47 = vadd.f32 %v1883_v20, %v1169_v27 }
 0x29e   : > { %v1885_v38 = vpop.eup %1884 }
 0x29f   : > { %v1181_v39 = vmul.f32 %v1885_v38, %v969_v52  ;;  %1426 = vst.msk [vmem:[%s2609_s16 + $0x30] sm:$0xff] %vm407_vm0, %v1391_v46  ;;  %v1174_v60 = vsel %vm1173_vm1, %v1883_v20, %v1170_v47  ;;  %vm1186_vm3 = vweird.f32 %v1885_v38 }
 0x2a0   : > { %v1179_v55 = vsel %vm1176_vm2, %v1178_v7, %v1174_v60  ;;  %vm1187_vm5 = vmor %vm1185_vm4, %vm1186_vm3 }
 0x2a1   : > { %v1182_v9 = vsub.f32 1.0, %v1181_v39  ;;  %v1222_v3 = vmul.f32 %v2583_v28, %v1179_v55  ;;  %v1223_v40 = vmul.f32 %v2586_v41, %v1179_v55  ;;  %v1192_v41 = vor.u32 1.1754944e-38, %v1191_v17 }
 0x2a3   : > { %v1183_v57 = vmul.f32 %v1885_v38, %v1182_v9  ;;  %1254 = vst [vmem:[%s2477_s10 + $0xe0] sm:$0xff] %v1222_v3  ;;  %1348 = vmatmul.f32.gmra.mxu2 %v1222_v3  ;;  %1413 = vmatmul.f32.gmra.mxu3 %v1223_v40 }
 0x2a4   : > { %1255 = vst [vmem:[%s2477_s10 + $0xe8] sm:$0xff] %v1223_v40  ;;  %v1328_v10 = vpop.f32.mrf.mxu2  ;;  %v1393_v1 = vpop.f32.mrf.mxu3 }
 0x2a5   : > { %v1394_v51 = vadd.f32 %v1393_v1, %v1328_v10  ;;  %v1184_v28 = vadd.f32 %v1885_v38, %v1183_v57 }
 0x2a7   : > { %1427 = vst.msk [vmem:[%s2609_s16 + $0x38] sm:$0xff] %vm407_vm0, %v1394_v51  ;;  %v1188_v37 = vsel %vm1187_vm5, %v1885_v38, %v1184_v28 }
 0x2a8   : > { %v1193_v29 = vsel %vm1190_vm6, %v1192_v41, %v1188_v37 }
 0x2a9   : > { %v1224_v43 = vmul.f32 %v2596_v22, %v1193_v29  ;;  %v1225_v2 = vmul.f32 %v2598_v45, %v1193_v29 }
 0x2ab   : > { %1256 = vst [vmem:[%s2477_s10 + $0xf0] sm:$0xff] %v1224_v43  ;;  %1351 = vmatmul.f32.gmra.mxu2 %v1224_v43  ;;  %1416 = vmatmul.f32.gmra.mxu3 %v1225_v2 }
 0x2ac   : > { %1257 = vst [vmem:[%s2477_s10 + $0xf8] sm:$0xff] %v1225_v2 }
 0x2ad   : > { %1913 = shalt.err (!%p1910_p7)
}
 0x2ae   : > { %s1982_s12 = smov 256   ;;  %s1983_s10 = smov 16  }
 0x2af   : > { %1717 = dma.vmem_to_hbm [thread:$0]  (%p2065_p3), %s1466_s14, 4096, %s1468_s15, %s1446_s0, %s1982_s12, %s1982_s12, %s1983_s10  }
 0x2f6   : > { %v1331_v22 = vpop.f32.mrf.mxu2  ;;  %v1396_v45 = vpop.f32.mrf.mxu3 }
 0x2f7   : > { %v1397_v59 = vadd.f32 %v1396_v45, %v1331_v22 }
 0x2f9   : > { %1428 = vst.msk [vmem:[%s2609_s16 + $0x40] sm:$0xff] %vm407_vm0, %v1397_v59 }
 0x2fe   : > { %v1334_v30 = vpop.f32.mrf.mxu2  ;;  %v1399_v32 = vpop.f32.mrf.mxu3 }
 0x2ff   : > { %v1400_v0 = vadd.f32 %v1399_v32, %v1334_v30 }
 0x301   : > { %1429 = vst.msk [vmem:[%s2609_s16 + $0x48] sm:$0xff] %vm407_vm0, %v1400_v0 }
 0x306   : > { %v1337_v6 = vpop.f32.mrf.mxu2  ;;  %v1402_v53 = vpop.f32.mrf.mxu3 }
 0x307   : > { %v1403_v14 = vadd.f32 %v1402_v53, %v1337_v6 }
 0x309   : > { %1430 = vst.msk [vmem:[%s2609_s16 + $0x50] sm:$0xff] %vm407_vm0, %v1403_v14 }
 0x30e   : > { %v1340_v5 = vpop.f32.mrf.mxu2  ;;  %v1405_v8 = vpop.f32.mrf.mxu3 }
 0x30f   : > { %v1406_v54 = vadd.f32 %v1405_v8, %v1340_v5 }
 0x311   : > { %1431 = vst.msk [vmem:[%s2609_s16 + $0x58] sm:$0xff] %vm407_vm0, %v1406_v54 }
 0x316   : > { %v1343_v36 = vpop.f32.mrf.mxu2  ;;  %v1408_v16 = vpop.f32.mrf.mxu3 }
 0x317   : > { %v1409_v44 = vadd.f32 %v1408_v16, %v1343_v36 }
 0x319   : > { %1432 = vst.msk [vmem:[%s2609_s16 + $0x60] sm:$0xff] %vm407_vm0, %v1409_v44 }
 0x31e   : > { %v1346_v13 = vpop.f32.mrf.mxu2  ;;  %v1411_v11 = vpop.f32.mrf.mxu3 }
 0x31f   : > { %v1412_v18 = vadd.f32 %v1411_v11, %v1346_v13 }
 0x321   : > { %1433 = vst.msk [vmem:[%s2609_s16 + $0x68] sm:$0xff] %vm407_vm0, %v1412_v18 }
 0x326   : > { %v1349_v25 = vpop.f32.mrf.mxu2  ;;  %v1414_v12 = vpop.f32.mrf.mxu3 }
 0x327   : > { %v1415_v34 = vadd.f32 %v1414_v12, %v1349_v25 }
 0x329   : > { %1434 = vst.msk [vmem:[%s2609_s16 + $0x70] sm:$0xff] %vm407_vm0, %v1415_v34 }
 0x32e   : > { %v1352_v50 = vpop.f32.mrf.mxu2  ;;  %v1417_v19 = vpop.f32.mrf.mxu3 }
 0x32f   : > { %v1418_v61 = vadd.f32 %v1417_v19, %v1352_v50 }
 0x331   : > { %1435 = vst.msk [vmem:[%s2609_s16 + $0x78] sm:$0xff] %vm407_vm0, %v1418_v61 }
 0x332 PF: > { %p1723_p3 = scmp.ge.s32.totalorder %s1980_s25, 2  ;;  %s1494_s0 = sand.u32 1, %s1952_s18  }
 0x333   : > { %s1495_s1 = scalar_lea.sflag [#allocation3], %s1494_s0 }
 0x334   : > { %p1720_p9 = pnand %p1723_p3, %p2074_p8 }
 0x336   : > { %p1721_p10 = pneg %p1720_p9 }
 0x338   : > { %1947 = dma.done.wait (%p1721_p10), %s1495_s1, 4096  }
 0x339   : > { %1949 = vsyncadd (%p1721_p10), %s1495_s1, 4294963200  ;;  %s19_s25 = sadd.s32 1, %s1980_s25   ;;  %s2735_s18 = smov %s1956_s19 }
 0x33a   : > { %p16_p11 = scmp.ge.s32.totalorder %s19_s25, 10   ;;  %s2736_s19 = smov %s1960_s20 }
 0x33b   : > { %s2737_s20 = smov %s2083_s11  ;;  %s2738_s21 = smov %s1972_s23 }
 0x33c   : > { %s2739_s22 = smov %s1976_s24  ;;  %s2740_s23 = smov %s2743_s28 }
 0x33d   : > { %s2741_s24 = smov %s2747_s29  ;;  %18 = sbr.rel (!%p16_p11) target bundleno = 9 (0x9), region = 92 }
 0x342   :  { %1501 = vsyncpa [#allocation3], 1 }
 0x343   :  { %1503 = vsyncpa [#allocation3 + $0x1], 1 }

</bundles_post_ra>
